<compile_context>
chip_gen: v5e
topology: v5e:2x2
jax: 0.10.0
libtpu: 0.0.40
codegen_flags: <defaults>
</compile_context>

<pallas_src>
import functools
import math

import jax
import jax.numpy as jnp
from jax.experimental import pallas as pl
from jax.experimental.pallas import tpu as pltpu

SAMPLE_RATE = 44100
FRAME_RATE = 100
_FEATS_HOP = SAMPLE_RATE // FRAME_RATE          # 441
_FFT_FRAME_LENGTHS = [1024, 2048, 4096]
_LOG_EPS = 1e-16
_N_MELS = 80

KT = 512        # basis columns consumed per k grid step (MXU N dim)
MEL_PAD = 128   # mel bins padded to one lane width (sliced back to 80)
MAX_TF = 512    # max frames per tile (MXU M dim)


# ---------------------------------------------------------------------------
# Pallas kernel: log-mel for one FFT frame length.
#   frames : (1, TF, fft_len)          bf16 raw frames (one (b, f)-tile)
#   basis  : (n_k|1, fft_len, KT)      bf16 windowed DFT basis (resident|streamed)
#   mel    : (n_k|1, KT, MEL_PAD)      bf16 mel rows matching the basis columns
#   out    : (1, TF, MEL_PAD)          f32 log-mel (written on last k step)
#   acc    : VMEM (TF, MEL_PAD)        f32 running accumulation over k tiles
# ---------------------------------------------------------------------------
def _logmel_kernel(frames_ref, basis_ref, mel_ref, out_ref, acc_ref, *, resident):
    k = pl.program_id(2)

    @pl.when(k == 0)
    def _():
        acc_ref[...] = jnp.zeros_like(acc_ref)

    idx = k if resident else 0
    # Real-DFT matmul (window + half-swap folded into the basis columns).
    cs = jnp.dot(frames_ref[0], basis_ref[idx],
                 preferred_element_type=jnp.float32)            # (TF, KT) f32
    pw = cs * cs                                                # power per column
    # Mel projection in bf16 on the MXU, f32 accumulation.
    acc_ref[...] += jnp.dot(pw.astype(jnp.bfloat16), mel_ref[idx],
                            preferred_element_type=jnp.float32)

    @pl.when(k == pl.num_programs(2) - 1)
    def _():
        out_ref[0] = jnp.log(acc_ref[...] + _LOG_EPS)


def _vmem_capacity_bytes():
    """Generation-aware physical VMEM (v5e/v6e: 128 MiB, v7x: 64 MiB)."""
    try:
        return int(pltpu.get_tpu_info().vmem_capacity_bytes)
    except Exception:
        return 64 << 20   # conservative fallback (v7x-sized)


def _logmel_single_fft(frames, basis3, mel3, tf):
    """frames: (B, F_pad, fft_len) bf16; basis3: (n_k, fft_len, KT) bf16;
    mel3: (n_k, KT, MEL_PAD) bf16  ->  (B, F_pad, MEL_PAD) f32 log-mel."""
    B, f_pad, fft_len = frames.shape
    n_k, _, kt = basis3.shape
    nf = f_pad // tf

    # VMEM accounting: 2x (double-buffer) every pipelined operand, 1x for the
    # resident f32 accumulator; clamp to the chip's physical VMEM.
    frames_b = tf * fft_len * 2
    out_b = tf * MEL_PAD * 4
    acc_b = tf * MEL_PAD * 4
    basis_full_b = n_k * fft_len * kt * 2
    mel_full_b = n_k * kt * MEL_PAD * 2
    vmem_cap = _vmem_capacity_bytes()

    resident_need = 2 * (frames_b + out_b + basis_full_b + mel_full_b) + acc_b
    resident = resident_need + (16 << 20) <= vmem_cap   # leave Mosaic headroom
    if resident:
        # Basis + mel stay VMEM-resident: constant index_maps -> DMA'd from
        # HBM once per core, not once per frame tile.
        need = resident_need
        basis_spec = pl.BlockSpec((n_k, fft_len, kt), lambda b, f, k: (0, 0, 0))
        mel_spec = pl.BlockSpec((n_k, kt, MEL_PAD), lambda b, f, k: (0, 0, 0))
    else:
        # Small-VMEM fallback (v7x, fft_len=4096: basis is ~32 MiB): stream the
        # basis per k step; TF=512 keeps intensity above the v7x ridge.
        need = 2 * (frames_b + out_b + fft_len * kt * 2 + kt * MEL_PAD * 2) + acc_b
        basis_spec = pl.BlockSpec((1, fft_len, kt), lambda b, f, k: (k, 0, 0))
        mel_spec = pl.BlockSpec((1, kt, MEL_PAD), lambda b, f, k: (k, 0, 0))

    vmem_limit = int(min(need + (8 << 20), vmem_cap - (8 << 20)))

    return pl.pallas_call(
        functools.partial(_logmel_kernel, resident=resident),
        out_shape=jax.ShapeDtypeStruct((B, f_pad, MEL_PAD), jnp.float32),
        grid_spec=pltpu.PrefetchScalarGridSpec(
            num_scalar_prefetch=0,
            grid=(B, nf, n_k),
            in_specs=[
                pl.BlockSpec((1, tf, fft_len), lambda b, f, k: (b, f, 0)),
                basis_spec,
                mel_spec,
            ],
            out_specs=pl.BlockSpec((1, tf, MEL_PAD), lambda b, f, k: (b, f, 0)),
            scratch_shapes=[pltpu.VMEM((tf, MEL_PAD), jnp.float32)],
        ),
        compiler_params=pltpu.CompilerParams(
            dimension_semantics=("parallel", "parallel", "arbitrary"),
            vmem_limit_bytes=vmem_limit),
    )(frames, basis3, mel3)


# ---------------------------------------------------------------------------
# Glue (plain JAX): framing, parameter setup, windowed DFT basis construction.
# ---------------------------------------------------------------------------
def _make_frames(x, fft_len):
    """x: [B, num_samples] -> ([B, num_frames, fft_len], num_frames).

    Mirrors the reference exactly: left-pad fft_len//2 zeros, hop 441, and
    FRONT-pad incomplete tail frames (F.pad(frame, (0,0,pad,0)) in torch).
    """
    # TODO(synk): framing still materializes a ~9x-expanded array in HBM; for
    # long audio it could move into the kernel (pl.ANY waveform ref, per-tile
    # DMA + unaligned row extraction on the otherwise-idle XLU).
    B, n = x.shape
    half = fft_len // 2
    padded_len = n + half
    num_frames = -(-padded_len // _FEATS_HOP)
    xp = jnp.pad(x, ((0, 0), (half, 0)))
    starts = jnp.arange(num_frames, dtype=jnp.int32) * _FEATS_HOP
    front_pad = jnp.maximum(0, starts + fft_len - padded_len)      # per-frame
    j = jnp.arange(fft_len, dtype=jnp.int32)
    idx = starts[:, None] + j[None, :] - front_pad[:, None]
    idx = jnp.where(j[None, :] < front_pad[:, None], 0, idx)       # xp[:, 0] == 0
    return xp[:, idx], num_frames


def _choose_tf(num_frames, max_tf):
    """Frames per tile: multiple of 16 (bf16 sublane packing), capped at max_tf."""
    tf = -(-num_frames // 16) * 16
    return min(tf, max_tf)


def _basis_and_mel(window, mel, fft_len):
    """Windowed real-DFT basis (half-swap folded in) + matching mel rows.

    Only bins 0..N/2 are needed (conjugate symmetry); bins 0 and N/2 are purely
    real, so the Nyquist cos column takes the all-zero DC sin slot and the
    basis is exactly (fft_len, fft_len) -- no padded multiply-by-zero bins.
    Column j of `basis` pairs with row j of `mel_rows`, so
    (frames @ basis)**2 @ mel_rows == |rfft(swapped windowed frames)|**2 @ mel.
    """
    half = fft_len // 2
    n_i = jnp.arange(fft_len, dtype=jnp.int32)[:, None]
    k_i = jnp.arange(half + 1, dtype=jnp.int32)[None, :]
    # X_swapped[k] = sum_n x[n] * w[n] * exp(-2*pi*i*k*(n - half)/N)
    m = jnp.mod(k_i * (n_i - half), fft_len).astype(jnp.float32)
    phase = (2.0 * math.pi / fft_len) * m
    w = window[:, None]
    cosb = jnp.cos(phase) * w                                  # (fft_len, half+1)
    sinb = -jnp.sin(phase) * w
    basis = jnp.concatenate(
        [cosb[:, :half], cosb[:, half:half + 1], sinb[:, 1:half]], axis=1)
    mel_rows = jnp.concatenate(
        [mel[:half], mel[half:half + 1], mel[1:half]], axis=0)  # (fft_len, 80)
    mel_rows = jnp.pad(mel_rows, ((0, 0), (0, MEL_PAD - _N_MELS)))
    n_k = fft_len // KT
    basis3 = basis.reshape(fft_len, n_k, KT).transpose(1, 0, 2)  # (n_k, fft, KT)
    mel3 = mel_rows.reshape(n_k, KT, MEL_PAD)
    return basis3.astype(jnp.bfloat16), mel3.astype(jnp.bfloat16)


def init_params(key):
    """Deterministic synthetic stand-ins for the checkpointed window_/mel_ params."""
    params = {}
    for i, fft_len in enumerate(_FFT_FRAME_LENGTHS):
        n = jnp.arange(fft_len, dtype=jnp.float32)
        window = 0.5 - 0.5 * jnp.cos(2.0 * math.pi * n / fft_len)  # Hann
        kmel = jax.random.fold_in(key, i)
        mel = jax.random.uniform(kmel, (fft_len // 2 + 1, _N_MELS),
                                 jnp.float32, 0.0, 1e-3)
        params[fft_len] = (window, mel)
    return params


def spectrogram_extractor(params, x, max_tf=MAX_TF):
    """x: [batch, num_samples] float32 -> [batch, num_frames, 80, 3] float32."""
    # TODO(synk): frame_chunk_size is a memory-only chunking option in the
    # reference (identical results); we always process all frames at once.
    # NOTE: bf16 frames/basis with _LOG_EPS=1e-16 can amplify error on truly
    # silent bands (log of quantization noise); fine for non-degenerate audio.
    x_bf16 = x.astype(jnp.bfloat16)
    feats = []
    feats_num_timesteps = None
    for i, fft_len in enumerate(_FFT_FRAME_LENGTHS):
        window, mel = params[fft_len]
        basis3, mel3 = _basis_and_mel(window, mel, fft_len)

        frames, num_frames = _make_frames(x_bf16, fft_len)
        tf = _choose_tf(num_frames, max_tf)
        f_pad = -(-num_frames // tf) * tf
        frames = jnp.pad(frames, ((0, 0), (0, f_pad - num_frames), (0, 0)))

        out = _logmel_single_fft(frames, basis3, mel3, tf)
        out = out[:, :num_frames, :_N_MELS]
        if i == 0:
            feats_num_timesteps = num_frames
        else:
            assert num_frames > feats_num_timesteps
            out = out[:, :feats_num_timesteps]
        feats.append(out)
    return jnp.stack(feats, axis=-1)   # [B, num_frames, 80, 3]


# Pure-JAX reference (f32, uses jnp.fft.rfft) for a numerical sanity check.
def _ref_forward(params, x):
    feats = []
    t0 = None
    for i, fft_len in enumerate(_FFT_FRAME_LENGTHS):
        window, mel = params[fft_len]
        half = fft_len // 2
        frames, num_frames = _make_frames(x, fft_len)
        fr = frames * window[None, None, :]
        fr = jnp.concatenate([fr[..., half:], fr[..., :half]], axis=-1)
        spec = jnp.fft.rfft(fr, axis=-1)
        pw = jnp.real(spec) ** 2 + jnp.imag(spec) ** 2
        m = jnp.log(pw @ mel + _LOG_EPS)
        if i == 0:
            t0 = num_frames
        m = m[:, :t0]
        feats.append(m)
    return jnp.stack(feats, axis=-1)


if __name__ == "__main__":
    key = jax.random.PRNGKey(0)
    params = init_params(jax.random.fold_in(key, 123))

    # Small input: single frame tile per FFT length.
    x = jax.random.normal(jax.random.fold_in(key, 7), (2, 2000), jnp.float32)
    out = jax.block_until_ready(spectrogram_extractor(params, x))
    ref = jax.block_until_ready(_ref_forward(params, x))
    assert out.shape == ref.shape, (out.shape, ref.shape)
    assert out.shape[0] == 2 and out.shape[2] == _N_MELS and out.shape[3] == 3
    assert bool(jnp.all(jnp.isfinite(out)))
    assert float(jnp.max(jnp.abs(out - ref))) < 0.3

    # Longer input with a small frame tile: exercises nf > 1, frame padding
    # and the multi-tile grid / accumulator path.
    x2 = jax.random.normal(jax.random.fold_in(key, 11), (2, 24000), jnp.float32)
    out2 = jax.block_until_ready(spectrogram_extractor(params, x2, max_tf=32))
    ref2 = jax.block_until_ready(_ref_forward(params, x2))
    assert out2.shape == ref2.shape, (out2.shape, ref2.shape)
    assert bool(jnp.all(jnp.isfinite(out2)))
    assert float(jnp.max(jnp.abs(out2 - ref2))) < 0.3

    print("KERNEL_OK")
</pallas_src>

<mosaic_0001>
module attributes {stable_mosaic.version = 11 : i64} {
  func.func @_logmel_kernel(%arg0: i32, %arg1: i32, %arg2: i32, %arg3: memref<1x16x1024xbf16, #tpu.memory_space<vmem>>, %arg4: memref<2x1024x512xbf16, #tpu.memory_space<vmem>>, %arg5: memref<2x512x128xbf16, #tpu.memory_space<vmem>>, %arg6: memref<1x16x128xf32, #tpu.memory_space<vmem>>, %arg7: memref<16x128xf32, #tpu.memory_space<vmem>>) attributes {dimension_semantics = [#tpu.dimension_semantics<parallel>, #tpu.dimension_semantics<parallel>, #tpu.dimension_semantics<arbitrary>], iteration_bounds = array<i64: 2, 1, 2>, scalar_prefetch = 0 : i64, scratch_operands = 1 : i64, tpu.core_type = #tpu.core_type<tc>, window_params = [{transform_indices = @transform_0, window_bounds = array<i64: 1, 16, 1024>}, {pipeline_mode = #tpu.pipeline_mode<synchronous>, transform_indices = @transform_1, window_bounds = array<i64: 2, 1024, 512>}, {pipeline_mode = #tpu.pipeline_mode<synchronous>, transform_indices = @transform_2, window_bounds = array<i64: 2, 512, 128>}, {transform_indices = @transform_3, window_bounds = array<i64: 1, 16, 128>}]} {
    %c0_i32 = arith.constant 0 : i32
    %0 = arith.cmpi eq, %arg2, %c0_i32 : i32
    %1 = arith.extui %0 : i1 to i32
    %c0_i32_0 = arith.constant 0 : i32
    %2 = arith.cmpi ne, %1, %c0_i32_0 : i32
    scf.if %2 {
      %cst_13 = arith.constant 0.000000e+00 : f32
      %21 = vector.broadcast %cst_13 : f32 to vector<16x128xf32>
      %c0_14 = arith.constant 0 : index
      %c0_15 = arith.constant 0 : index
      %22 = vector.load %arg7[%c0_14, %c0_15] : memref<16x128xf32, #tpu.memory_space<vmem>>, vector<16x128xf32>
      tpu.vector_store %arg7[%c0_14, %c0_15], %21 {strides = array<i32>} : memref<16x128xf32, #tpu.memory_space<vmem>>, vector<16x128xf32>,
    } else {
    }
    %c0 = arith.constant 0 : index
    %c0_1 = arith.constant 0 : index
    %c0_2 = arith.constant 0 : index
    %3 = vector.load %arg3[%c0, %c0_1, %c0_2] : memref<1x16x1024xbf16, #tpu.memory_space<vmem>>, vector<1x16x1024xbf16>
    %4 = vector.shape_cast %3 : vector<1x16x1024xbf16> to vector<16x1024xbf16>
    %5 = arith.index_cast %arg2 : i32 to index
    %c0_3 = arith.constant 0 : index
    %c0_4 = arith.constant 0 : index
    %6 = vector.load %arg4[%5, %c0_3, %c0_4] : memref<2x1024x512xbf16, #tpu.memory_space<vmem>>, vector<1x1024x512xbf16>
    %7 = vector.shape_cast %6 : vector<1x1024x512xbf16> to vector<1024x512xbf16>
    %cst = arith.constant dense<0.000000e+00> : vector<16x512xf32>
    %8 = tpu.matmul %4, %7, %cst {dimension_numbers = #tpu.dot_dimension_numbers<[1], [0], [0], [1], [0, 0, 1, 1], [], []>} : vector<16x1024xbf16>, vector<1024x512xbf16>, vector<16x512xf32> -> vector<16x512xf32>
    %9 = arith.mulf %8, %8 : vector<16x512xf32>
    %c0_5 = arith.constant 0 : index
    %c0_6 = arith.constant 0 : index
    %10 = vector.load %arg7[%c0_5, %c0_6] : memref<16x128xf32, #tpu.memory_space<vmem>>, vector<16x128xf32>
    %11 = arith.truncf %9 : vector<16x512xf32> to vector<16x512xbf16>
    %12 = arith.index_cast %arg2 : i32 to index
    %c0_7 = arith.constant 0 : index
    %c0_8 = arith.constant 0 : index
    %13 = vector.load %arg5[%12, %c0_7, %c0_8] : memref<2x512x128xbf16, #tpu.memory_space<vmem>>, vector<1x512x128xbf16>
    %14 = vector.shape_cast %13 : vector<1x512x128xbf16> to vector<512x128xbf16>
    %cst_9 = arith.constant dense<0.000000e+00> : vector<16x128xf32>
    %15 = tpu.matmul %11, %14, %cst_9 {dimension_numbers = #tpu.dot_dimension_numbers<[1], [0], [0], [1], [0, 0, 1, 1], [], []>} : vector<16x512xbf16>, vector<512x128xbf16>, vector<16x128xf32> -> vector<16x128xf32>
    %16 = arith.addf %10, %15 : vector<16x128xf32>
    %c0_10 = arith.constant 0 : index
    %c0_11 = arith.constant 0 : index
    %17 = vector.load %arg7[%c0_10, %c0_11] : memref<16x128xf32, #tpu.memory_space<vmem>>, vector<16x128xf32>
    tpu.vector_store %arg7[%c0_10, %c0_11], %16 {strides = array<i32>} : memref<16x128xf32, #tpu.memory_space<vmem>>, vector<16x128xf32>,
    %c1_i32 = arith.constant 1 : i32
    %18 = arith.cmpi eq, %arg2, %c1_i32 : i32
    %19 = arith.extui %18 : i1 to i32
    %c0_i32_12 = arith.constant 0 : i32
    %20 = arith.cmpi ne, %19, %c0_i32_12 : i32
    scf.if %20 {
      %c0_13 = arith.constant 0 : index
      %c0_14 = arith.constant 0 : index
      %21 = vector.load %arg7[%c0_13, %c0_14] : memref<16x128xf32, #tpu.memory_space<vmem>>, vector<16x128xf32>
      %cst_15 = arith.constant 1.000000e-16 : f32
      %22 = vector.broadcast %cst_15 : f32 to vector<16x128xf32>
      %23 = arith.addf %21, %22 : vector<16x128xf32>
      %24 = math.log %23 : vector<16x128xf32>
      %c0_16 = arith.constant 0 : index
      %c0_17 = arith.constant 0 : index
      %c0_18 = arith.constant 0 : index
      %25 = vector.load %arg6[%c0_16, %c0_17, %c0_18] : memref<1x16x128xf32, #tpu.memory_space<vmem>>, vector<1x16x128xf32>
      %26 = vector.shape_cast %25 : vector<1x16x128xf32> to vector<16x128xf32>
      %27 = vector.shape_cast %24 : vector<16x128xf32> to vector<1x16x128xf32>
      tpu.vector_store %arg6[%c0_16, %c0_17, %c0_18], %27 {strides = array<i32>} : memref<1x16x128xf32, #tpu.memory_space<vmem>>, vector<1x16x128xf32>,
    } else {
    }
    return
  }
  func.func @transform_0(%arg0: i32, %arg1: i32, %arg2: i32) -> (i32, i32, i32) {
    %c0_i32 = arith.constant 0 : i32
    %c0_i32_0 = arith.constant 0 : i32
    return %arg0, %arg1, %c0_i32 : i32, i32, i32
  }
  func.func @transform_1(%arg0: i32, %arg1: i32, %arg2: i32) -> (i32, i32, i32) {
    %c0_i32 = arith.constant 0 : i32
    %c0_i32_0 = arith.constant 0 : i32
    %c0_i32_1 = arith.constant 0 : i32
    %c0_i32_2 = arith.constant 0 : i32
    return %c0_i32, %c0_i32_0, %c0_i32_1 : i32, i32, i32
  }
  func.func @transform_2(%arg0: i32, %arg1: i32, %arg2: i32) -> (i32, i32, i32) {
    %c0_i32 = arith.constant 0 : i32
    %c0_i32_0 = arith.constant 0 : i32
    %c0_i32_1 = arith.constant 0 : i32
    %c0_i32_2 = arith.constant 0 : i32
    return %c0_i32, %c0_i32_0, %c0_i32_1 : i32, i32, i32
  }
  func.func @transform_3(%arg0: i32, %arg1: i32, %arg2: i32) -> (i32, i32, i32) {
    %c0_i32 = arith.constant 0 : i32
    %c0_i32_0 = arith.constant 0 : i32
    return %arg0, %arg1, %c0_i32 : i32, i32, i32
  }
}

</mosaic_0001>

<bundles_post_ra>
// kernel: tpu_custom_call.1
= control target key start
LH: loop header
LB: loop body
LE: loop exit
PB: predicated region body
PF: predicated region fallthrough
CT: control target
= control target key end

     0   :  { %s5464_s0 = inlined_call_operand.hbm [shape: bf16[2,16,1024], index: 0, kind: input, shape index: {}]   ;;  %s5465_s1 = inlined_call_operand.hbm [shape: bf16[2,1024,512], index: 1, kind: input, shape index: {}]   ;;  %s5466_s2 = inlined_call_operand.hbm [shape: bf16[2,512,128], index: 2, kind: input, shape index: {}]   ;;  %s5467_s3 = inlined_call_operand.hbm [shape: f32[2,16,128], index: 3, kind: output, shape index: {}]  }
   0x1   :  { %5469 = sst [smem:[#allocation15_spill]] %s5465_s1 }
   0x2   :  { %5470 = sst [smem:[#allocation16_spill]] %s5466_s2 }
   0x3   :  { %8 = vsyncpa [#allocation4], 0 }
   0x4   :  { %10 = vsyncpa [#allocation4 + $0x1], 0 }
   0x5   :  { %11 = vsyncpa [#allocation7], 0 }
   0x6   :  { %12 = vsyncpa [#allocation5], 0 }
   0x7   :  { %14 = vsyncpa [#allocation5 + $0x1], 0  ;;  %s4620_s12 = smov 0   ;;  %s4622_s13 = smov 0  }
   0x8   :  { %s4624_s14 = smov 0   ;;  %s4626_s15 = smov 0  }
   0x9   :  { %s4628_s16 = smov 0   ;;  %s4630_s17 = smov 0  }
   0xa   :  { %s4632_s18 = smov 0   ;;  %s4634_s19 = smov 0  }
   0xb LB: > { %5471 = sst [smem:[#allocation13_spill]] %s4579_s17  ;;  %s2774_s20 = sadd.s32 4294967295, %s4587_s19   ;;  %s4587_s19 = sphi %s4634_s19, %s20_s19   ;;  %s4583_s18 = sphi %s4632_s18, %s5488_s18   ;;  %s4579_s17 = sphi %s4630_s17, %s5483_s17   ;;  %s4575_s16 = sphi %s4628_s16, %s5487_s16   ;;  %s4571_s15 = sphi %s4626_s15, %s5482_s15   ;;  %s4567_s14 = sphi %s4624_s14, %s5486_s14   ;;  %s4563_s13 = sphi %s4622_s13, %s5485_s13   ;;  %s4559_s12 = sphi %s4620_s12, %s5484_s12  }
   0xc   : > { %s2775_s21 = sadd.s32 4294967294, %s4587_s19   ;;  %p61_p0 = scmp.ne.s32.totalorder %s4563_s13, %s4559_s12 }
   0xd   : > { %p4664_p1 = scmp.eq.s32.totalorder %s2774_s20, 0  ;;  %p4668_p2 = scmp.eq.s32.totalorder %s2774_s20, 3 }
   0xe   : > { %p135_p3 = scmp.eq.s32.totalorder %s2775_s21, 3  ;;  %p2776_p5 = scmp.ge.s32.totalorder %s4587_s19, 1 }
   0xf   : > { %p4674_p4 = por %p4664_p1, %p61_p0  ;;  %p142_p7 = scmp.lt.s32.totalorder %s4587_s19, 5 }
  0x10   : > { %p4679_p6 = por %p135_p3, %p61_p0  ;;  %s5476_s1 = sld [smem:[#allocation15_spill]] }
  0x11   : > { %p4687_p8 = pnand %p2776_p5, %p142_p7  ;;  %s4589_s30 = smov [#allocation6]  }
  0x12   : > { %s155_s4 = sshll.u32 %s4589_s30, 4  ;;  %s5478_s2 = sld [smem:[#allocation16_spill]]  ;;  %s156_s4 = int_to_ptr.vmem [resolvable:$true] %s155_s4 }
  0x13   : > { %p4295_p9 = pneg %p4687_p8  ;;  %s4590_s8 = smov 256  }
  0x14   : > { %s4591_s9 = smov 16   ;;  %s4592_s10 = smov [#allocation8]  }
  0x15   : > { %p4296_p10 = pnand %p4295_p9, %p4664_p1  ;;  %s169_s11 = sshll.u32 %s4592_s10, 4  ;;  %s170_s11 = int_to_ptr.vmem [resolvable:$true] %s169_s11 }
  0x16   : > { %s153_s28 = sshll.u32 %s5476_s1, 4  ;;  %s4593_s20 = smov 64   ;;  %s154_s28 = int_to_ptr.hbm [resolvable:$true] %s153_s28 }
  0x17   : > { %4298 = dma.hbm_to_vmem [thread:$0]  (!%p4296_p10), %s154_s28, 65536, %s156_s4, [#allocation7], %s4590_s8, %s4590_s8, %s4591_s9  }
  0x18   : > { %s167_s7 = sshll.u32 %s5478_s2, 4  ;;  %s4594_s21 = smov 4   ;;  %s168_s7 = int_to_ptr.hbm [resolvable:$true] %s167_s7 }
  0x19   : > { %4301 = dma.hbm_to_vmem [thread:$0]  (!%p4296_p10), %s168_s7, 8192, %s170_s11, [#allocation7], %s4593_s20, %s4593_s20, %s4594_s21  }
  0x1a   : > { %s32_s26 = sadd.s32 1, %s4579_s17  ;;  %s39_s27 = sadd.s32 1, %s4583_s18 }
  0x1b   : > { %p33_p11 = scmp.ge.s32.totalorder %s32_s26, 2  ;;  %s48_s30 = sadd.s32 1, %s4567_s14 }
  0x1c   : > { %p55_p12 = scmp.ne.s32.totalorder %s4567_s14, %s4563_s13  ;;  %p56_p13 = scmp.eq.s32.totalorder %s4587_s19, 0 }
  0x1d   : > { %s5490_s26 = smov (%p33_p11, %s32_s26), 0  ;;  %s5492_s27 = smov (!%p33_p11, %s39_s27), %s4583_s18 }
  0x1e   : > { %5479 = sst [smem:[#allocation14_spill]] %s5490_s26  ;;  %p4707_p0 = por %p56_p13, %p55_p12 }
  0x1f   : > { %p4713_p3 = por %p4668_p2, %p55_p12  ;;  %p41_p5 = scmp.ge.s32.totalorder %s5492_s27, 2 }
  0x20   : > { %p4312_p7 = scmp.lt.s32.totalorder %s4587_s19, 4  ;;  %s183_s5 = sand.u32 1, %s4567_s14  }
  0x21   : > { %s3983_s6 = sshll.u32 %s4583_s18, 6  ;;  %s5494_s27 = smov (%p41_p5, %s5492_s27), 0 }
  0x22   : > { %s2780_s7 = sshll.u32 %s183_s5, 6  ;;  %s43_s8 = ssub.s32 %s4583_s18, %s5494_s27 }
  0x23   : > { %p46_p9 = scmp.eq.s32.totalorder %s43_s8, 0  ;;  %s195_s23 = scalar_lea.hbm %s5464_s0, %s3983_s6 }
  0x24   : > { %s196_s11 = sshll.u32 %s195_s23, 4  ;;  %s187_s20 = scalar_lea.vmem [#allocation3], %s2780_s7  ;;  %s197_s11 = int_to_ptr.hbm [resolvable:$true] %s196_s11 }
  0x25   : > { %s198_s21 = sshll.u32 %s187_s20, 4  ;;  %p4303_p2 = pnand %p4312_p7, %p4707_p0  ;;  %s199_s21 = int_to_ptr.vmem [resolvable:$true] %s198_s21 }
  0x26   : > { %s4728_s1 = scalar_select %p46_p9, %s4567_s14, %s48_s30  }
  0x27   : > { %s184_s2 = scalar_lea.sflag [#allocation4], %s183_s5  ;;  %s4595_s26 = smov 512  }
  0x28   : > { %s4596_s17 = smov 32   ;;  %210 = sbr.rel (%p4687_p8) target bundleno = 650 (0x28a), region = 32 }
  0x29   : > { %4305 = dma.hbm_to_vmem [thread:$0]  (!%p4303_p2), %s197_s11, 1024, %s199_s21, %s184_s2, %s4595_s26, %s4595_s26, %s4596_s17  }
  0x2a   : > { %s4737_s6 = sand.u32 (!%p4687_p8), 1, %s4563_s13  }
  0x2b   : > { %s2784_s30 = sshll.u32 (!%p4687_p8), %s4737_s6, 6  ;;  %s213_s7 = scalar_lea.sflag (!%p4687_p8), [#allocation4], %s4737_s6 }
  0x2c   : > { %s4741_s8 = scalar_lea.vmem (!%p4687_p8), [#allocation3], %s2784_s30 }
  0x2d   : > { %4546 = dma.done.wait (%p4674_p4), %s213_s7, 1024  }
  0x2e   : > { %4548 = vsyncadd (%p4674_p4), %s213_s7, 4294966272 }
  0x2f   : > { %4550 = dma.done.wait (%p4664_p1), [#allocation7], 73728  }
  0x30   : > { %4552 = vsyncadd (%p4664_p1), [#allocation7], 4294893568  ;;  %s2787_s2 = sshll.u32 %s4737_s6, 4  ;;  %p2788_p8 = scmp.ne.s32.totalorder %s4571_s15, 0 }
  0x31   : > { %s4752_s17 = scalar_lea.vmem [#allocation9], %s2787_s2 }
  0x32   : > { %255 = sbr.rel (%p2788_p8) target bundleno = 58 (0x3a), region = 48 }
  0x37   : > { %v4597_v0 = vmov 0.0  }
  0x38   : > { %256 = vst [vmem:[#allocation2] sm:$0xff] %v4597_v0 }
  0x39   : > { %257 = vst [vmem:[#allocation2 + $0x8] sm:$0xff] %v4597_v0 }
  0x3a PF: > { %s3992_s24 = sshll.u32 %s4571_s15, 11  ;;  %s4249_s22 = sshll.u32 %s4571_s15, 8 }
  0x3b   : > { %s4756_s29 = scalar_lea.vmem [#allocation6], %s3992_s24  ;;  %s5363_s26 = scalar_lea.vmem [#allocation8], %s4249_s22 }
  0x3c   : > { %v2937_v1 = vld [vmem:[%s4756_s29 + $0xe0] sm:$0xf]  ;;  %v4023_v2 = vld [vmem:[%s4756_s29 + $0xec] sm:$0xf0]  ;;  %p3977_p1 = scmp.ne.s32.totalorder %s4571_s15, 1 }
  0x3d   : > { %v3065_v3 = vld [vmem:[%s4756_s29 + $0x1e0] sm:$0xf]  ;;  %v2938_v4 = vor.u32 %v4023_v2, %v2937_v1  ;;  %v4055_v5 = vld [vmem:[%s4756_s29 + $0x1ec] sm:$0xf0] }
  0x3e   : > { %v3193_v6 = vld [vmem:[%s4756_s29 + $0x2e0] sm:$0xf]  ;;  %v4087_v7 = vld [vmem:[%s4756_s29 + $0x2ec] sm:$0xf0]  ;;  %v3066_v8 = vor.u32 %v4055_v5, %v3065_v3 }
  0x3f   : > { %v3194_v9 = vor.u32 %v4087_v7, %v3193_v6  ;;  %v3321_v10 = vld [vmem:[%s4756_s29 + $0x3e0] sm:$0xf]  ;;  %v4119_v11 = vld [vmem:[%s4756_s29 + $0x3ec] sm:$0xf0]  ;;  %1845 = vmatpush.bf16.msra.mxu0 %v2938_v4 }
  0x40   : > { %v2921_v12 = vld [vmem:[%s4756_s29 + $0xc0] sm:$0xf]  ;;  %v3322_v13 = vor.u32 %v4119_v11, %v3321_v10  ;;  %v4019_v14 = vld [vmem:[%s4756_s29 + $0xcc] sm:$0xf0]  ;;  %1859 = vmatpush.bf16.msra.mxu1 %v3066_v8 }
  0x41   : > { %v3049_v15 = vld [vmem:[%s4756_s29 + $0x1c0] sm:$0xf]  ;;  %v4051_v16 = vld [vmem:[%s4756_s29 + $0x1cc] sm:$0xf0]  ;;  %1873 = vmatpush.bf16.msra.mxu2 %v3194_v9  ;;  %v2922_v17 = vor.u32 %v4019_v14, %v2921_v12 }
  0x42   : > { %v3050_v18 = vor.u32 %v4051_v16, %v3049_v15  ;;  %v3177_v19 = vld [vmem:[%s4756_s29 + $0x2c0] sm:$0xf]  ;;  %v4083_v20 = vld [vmem:[%s4756_s29 + $0x2cc] sm:$0xf0]  ;;  %1887 = vmatpush.bf16.msra.mxu3 %v3322_v13 }
  0x43   : > { %v3305_v21 = vld [vmem:[%s4756_s29 + $0x3c0] sm:$0xf]  ;;  %v3178_v22 = vor.u32 %v4083_v20, %v3177_v19  ;;  %v4115_v23 = vld [vmem:[%s4756_s29 + $0x3cc] sm:$0xf0]  ;;  %1846 = vmatpush.bf16.msra.mxu0 %v2922_v17 }
  0x44   : > { %v2905_v24 = vld [vmem:[%s4756_s29 + $0xa0] sm:$0xf]  ;;  %v4015_v25 = vld [vmem:[%s4756_s29 + $0xac] sm:$0xf0]  ;;  %v3306_v26 = vor.u32 %v4115_v23, %v3305_v21  ;;  %1860 = vmatpush.bf16.msra.mxu1 %v3050_v18 }
  0x45   : > { %v3033_v27 = vld [vmem:[%s4756_s29 + $0x1a0] sm:$0xf]  ;;  %v4047_v28 = vld [vmem:[%s4756_s29 + $0x1ac] sm:$0xf0]  ;;  %v2906_v30 = vor.u32 %v4015_v25, %v2905_v24  ;;  %1874 = vmatpush.bf16.msra.mxu2 %v3178_v22 }
  0x46   : > { %v3161_v29 = vld [vmem:[%s4756_s29 + $0x2a0] sm:$0xf]  ;;  %v4079_v31 = vld [vmem:[%s4756_s29 + $0x2ac] sm:$0xf0]  ;;  %v3034_v34 = vor.u32 %v4047_v28, %v3033_v27  ;;  %1888 = vmatpush.bf16.msra.mxu3 %v3306_v26 }
  0x47   : > { %v3289_v32 = vld [vmem:[%s4756_s29 + $0x3a0] sm:$0xf]  ;;  %v4111_v33 = vld [vmem:[%s4756_s29 + $0x3ac] sm:$0xf0]  ;;  %v3162_v35 = vor.u32 %v4079_v31, %v3161_v29  ;;  %1847 = vmatpush.bf16.msra.mxu0 %v2906_v30 }
  0x48   : > { %v2889_v36 = vld [vmem:[%s4756_s29 + $0x80] sm:$0xf]  ;;  %v4011_v37 = vld [vmem:[%s4756_s29 + $0x8c] sm:$0xf0]  ;;  %v3290_v39 = vor.u32 %v4111_v33, %v3289_v32  ;;  %1861 = vmatpush.bf16.msra.mxu1 %v3034_v34 }
  0x49   : > { %v3017_v38 = vld [vmem:[%s4756_s29 + $0x180] sm:$0xf]  ;;  %v4043_v40 = vld [vmem:[%s4756_s29 + $0x18c] sm:$0xf0]  ;;  %v2890_v45 = vor.u32 %v4011_v37, %v2889_v36  ;;  %1875 = vmatpush.bf16.msra.mxu2 %v3162_v35 }
  0x4a   : > { %v3145_v41 = vld [vmem:[%s4756_s29 + $0x280] sm:$0xf]  ;;  %v4075_v42 = vld [vmem:[%s4756_s29 + $0x28c] sm:$0xf0]  ;;  %v3018_v46 = vor.u32 %v4043_v40, %v3017_v38  ;;  %1889 = vmatpush.bf16.msra.mxu3 %v3290_v39 }
  0x4b   : > { %v3273_v43 = vld [vmem:[%s4756_s29 + $0x380] sm:$0xf]  ;;  %v4107_v44 = vld [vmem:[%s4756_s29 + $0x38c] sm:$0xf0]  ;;  %v3146_v47 = vor.u32 %v4075_v42, %v3145_v41  ;;  %1848 = vmatpush.bf16.msra.mxu0 %v2890_v45 }
  0x4c   : > { %v2873_v48 = vld [vmem:[%s4756_s29 + $0x60] sm:$0xf]  ;;  %v4007_v49 = vld [vmem:[%s4756_s29 + $0x6c] sm:$0xf0]  ;;  %v3274_v51 = vor.u32 %v4107_v44, %v3273_v43  ;;  %1862 = vmatpush.bf16.msra.mxu1 %v3018_v46 }
  0x4d   : > { %v3001_v50 = vld [vmem:[%s4756_s29 + $0x160] sm:$0xf]  ;;  %v4039_v52 = vld [vmem:[%s4756_s29 + $0x16c] sm:$0xf0]  ;;  %v2874_v57 = vor.u32 %v4007_v49, %v2873_v48  ;;  %1876 = vmatpush.bf16.msra.mxu2 %v3146_v47 }
  0x4e   : > { %v3129_v53 = vld [vmem:[%s4756_s29 + $0x260] sm:$0xf]  ;;  %v4071_v54 = vld [vmem:[%s4756_s29 + $0x26c] sm:$0xf0]  ;;  %v3002_v58 = vor.u32 %v4039_v52, %v3001_v50  ;;  %1890 = vmatpush.bf16.msra.mxu3 %v3274_v51 }
  0x4f   : > { %v3257_v55 = vld [vmem:[%s4756_s29 + $0x360] sm:$0xf]  ;;  %v4103_v56 = vld [vmem:[%s4756_s29 + $0x36c] sm:$0xf0]  ;;  %v3130_v59 = vor.u32 %v4071_v54, %v3129_v53  ;;  %1849 = vmatpush.bf16.msra.mxu0 %v2874_v57 }
  0x50   : > { %v2857_v60 = vld [vmem:[%s4756_s29 + $0x40] sm:$0xf]  ;;  %v4003_v61 = vld [vmem:[%s4756_s29 + $0x4c] sm:$0xf0]  ;;  %v3258_v63 = vor.u32 %v4103_v56, %v3257_v55  ;;  %1863 = vmatpush.bf16.msra.mxu1 %v3002_v58  ;;  %v2801_v55 = vld [vmem:[%s4741_s8 + $0x8] sm:$0xf] }
  0x51   : > { %v2985_v62 = vld [vmem:[%s4756_s29 + $0x140] sm:$0xf]  ;;  %v4035_v0 = vld [vmem:[%s4756_s29 + $0x14c] sm:$0xf0]  ;;  %v2858_v5 = vor.u32 %v4003_v61, %v2857_v60  ;;  %1877 = vmatpush.bf16.msra.mxu2 %v3130_v59  ;;  %v3989_v60 = vld [vmem:[%s4741_s8 + $0x24] sm:$0xf0] }
  0x52   : > { %v3113_v1 = vld [vmem:[%s4756_s29 + $0x240] sm:$0xf]  ;;  %v4067_v2 = vld [vmem:[%s4756_s29 + $0x24c] sm:$0xf0]  ;;  %v2986_v6 = vor.u32 %v4035_v0, %v2985_v62  ;;  %1891 = vmatpush.bf16.msra.mxu3 %v3258_v63 }
  0x53   : > { %v3241_v3 = vld [vmem:[%s4756_s29 + $0x340] sm:$0xf]  ;;  %v4099_v4 = vld [vmem:[%s4756_s29 + $0x34c] sm:$0xf0]  ;;  %v3114_v7 = vor.u32 %v4067_v2, %v3113_v1  ;;  %1850 = vmatpush.bf16.msra.mxu0 %v2858_v5  ;;  %v4849_v2 = vor.u32 %v3989_v60, %v2801_v55 }
  0x54   : > { %v2841_v8 = vld [vmem:[%s4756_s29 + $0x20] sm:$0xf]  ;;  %v3999_v9 = vld [vmem:[%s4756_s29 + $0x2c] sm:$0xf0]  ;;  %v3242_v11 = vor.u32 %v4099_v4, %v3241_v3  ;;  %1864 = vmatpush.bf16.msra.mxu1 %v2986_v6 }
  0x55   : > { %v2969_v10 = vld [vmem:[%s4756_s29 + $0x120] sm:$0xf]  ;;  %v4031_v12 = vld [vmem:[%s4756_s29 + $0x12c] sm:$0xf0]  ;;  %v2842_v17 = vor.u32 %v3999_v9, %v2841_v8  ;;  %1878 = vmatpush.bf16.msra.mxu2 %v3114_v7  ;;  %v3984_v7 = vld [vmem:[%s4741_s8 + $0x4] sm:$0xf] }
  0x56   : > { %v3097_v13 = vld [vmem:[%s4756_s29 + $0x220] sm:$0xf]  ;;  %v4063_v14 = vld [vmem:[%s4756_s29 + $0x22c] sm:$0xf0]  ;;  %v2970_v20 = vor.u32 %v4031_v12, %v2969_v10  ;;  %1892 = vmatpush.bf16.msra.mxu3 %v3242_v11  ;;  %v2795_v8 = vld [vmem:[%s4741_s8 + $0x20] sm:$0xf0] }
  0x57   : > { %v3225_v15 = vld [vmem:[%s4756_s29 + $0x320] sm:$0xf]  ;;  %v4095_v16 = vld [vmem:[%s4756_s29 + $0x32c] sm:$0xf0]  ;;  %v3098_v21 = vor.u32 %v4063_v14, %v3097_v13  ;;  %1851 = vmatpush.bf16.msra.mxu0 %v2842_v17  ;;  %v3985_v9 = vld [vmem:[%s4741_s8 + $0xc] sm:$0xf]  ;;  %v4859_v11 = vor.u32 %v3984_v7, %v2795_v8 }
  0x58   : > { %v2825_v18 = vld [vmem:[%s4756_s29] sm:$0xf]  ;;  %v3995_v19 = vld [vmem:[%s4756_s29 + $0xc] sm:$0xf0]  ;;  %v3226_v25 = vor.u32 %v4095_v16, %v3225_v15  ;;  %1865 = vmatpush.bf16.msra.mxu1 %v2970_v20  ;;  %v2803_v12 = vld [vmem:[%s4741_s8 + $0x28] sm:$0xf0] }
  0x59   : > { %v2953_v22 = vld [vmem:[%s4756_s29 + $0x100] sm:$0xf]  ;;  %v4027_v23 = vld [vmem:[%s4756_s29 + $0x10c] sm:$0xf0]  ;;  %v2826_v32 = vor.u32 %v3995_v19, %v2825_v18  ;;  %1879 = vmatpush.bf16.msra.mxu2 %v3098_v21  ;;  %v4865_v18 = vor.u32 %v3985_v9, %v2803_v12 }
  0x5a   : > { %v3081_v24 = vld [vmem:[%s4756_s29 + $0x200] sm:$0xf]  ;;  %v4059_v26 = vld [vmem:[%s4756_s29 + $0x20c] sm:$0xf0]  ;;  %v2954_v36 = vor.u32 %v4027_v23, %v2953_v22  ;;  %1893 = vmatpush.bf16.msra.mxu3 %v3226_v25 }
  0x5b   : > { %v3209_v27 = vld [vmem:[%s4756_s29 + $0x300] sm:$0xf]  ;;  %v4091_v28 = vld [vmem:[%s4756_s29 + $0x30c] sm:$0xf0]  ;;  %v3082_v37 = vor.u32 %v4059_v26, %v3081_v24  ;;  %1852 = vmatpush.bf16.msra.mxu0 %v2826_v32 }
  0x5c   : > { %v3449_v29 = vld [vmem:[%s4756_s29 + $0x4e0] sm:$0xf]  ;;  %v4151_v30 = vld [vmem:[%s4756_s29 + $0x4ec] sm:$0xf0]  ;;  %v3210_v40 = vor.u32 %v4091_v28, %v3209_v27  ;;  %1866 = vmatpush.bf16.msra.mxu1 %v2954_v36 }
  0x5d   : > { %v3577_v31 = vld [vmem:[%s4756_s29 + $0x5e0] sm:$0xf]  ;;  %v4183_v33 = vld [vmem:[%s4756_s29 + $0x5ec] sm:$0xf0]  ;;  %v3450_v41 = vor.u32 %v4151_v30, %v3449_v29  ;;  %1880 = vmatpush.bf16.msra.mxu2 %v3082_v37 }
  0x5e   : > { %v3705_v34 = vld [vmem:[%s4756_s29 + $0x6e0] sm:$0xf]  ;;  %v4215_v35 = vld [vmem:[%s4756_s29 + $0x6ec] sm:$0xf0]  ;;  %v3578_v44 = vor.u32 %v4183_v33, %v3577_v31  ;;  %1894 = vmatpush.bf16.msra.mxu3 %v3210_v40 }
  0x5f   : > { %v3833_v38 = vld [vmem:[%s4756_s29 + $0x7e0] sm:$0xf]  ;;  %v4247_v39 = vld [vmem:[%s4756_s29 + $0x7ec] sm:$0xf0]  ;;  %v3706_v45 = vor.u32 %v4215_v35, %v3705_v34  ;;  %1901 = vmatpush.bf16.msrb.mxu0 %v3450_v41  ;;  %1867 = vmatmul.bf16.vlgmr.msra.gmra.mxu1 %v4859_v11 }
  0x60   : > { %v3433_v42 = vld [vmem:[%s4756_s29 + $0x4c0] sm:$0xf]  ;;  %v4147_v43 = vld [vmem:[%s4756_s29 + $0x4cc] sm:$0xf0]  ;;  %v3834_v49 = vor.u32 %v4247_v39, %v3833_v38  ;;  %1915 = vmatpush.bf16.msrb.mxu1 %v3578_v44  ;;  %1881 = vmatmul.bf16.vlgmr.msra.gmra.mxu2 %v4849_v2 }
  0x61   : > { %v3561_v46 = vld [vmem:[%s4756_s29 + $0x5c0] sm:$0xf]  ;;  %v4179_v47 = vld [vmem:[%s4756_s29 + $0x5cc] sm:$0xf0]  ;;  %v3434_v56 = vor.u32 %v4147_v43, %v3433_v42  ;;  %1929 = vmatpush.bf16.msrb.mxu2 %v3706_v45  ;;  %1895 = vmatmul.bf16.vlgmr.msra.gmra.mxu3 %v4865_v18 }
  0x62   : > { %v3689_v48 = vld [vmem:[%s4756_s29 + $0x6c0] sm:$0xf]  ;;  %v4211_v50 = vld [vmem:[%s4756_s29 + $0x6cc] sm:$0xf0]  ;;  %v3562_v61 = vor.u32 %v4179_v47, %v3561_v46  ;;  %1943 = vmatpush.bf16.msrb.mxu3 %v3834_v49 }
  0x63   : > { %v3817_v51 = vld [vmem:[%s4756_s29 + $0x7c0] sm:$0xf]  ;;  %v4243_v52 = vld [vmem:[%s4756_s29 + $0x7cc] sm:$0xf0]  ;;  %v3690_v62 = vor.u32 %v4211_v50, %v3689_v48  ;;  %1902 = vmatpush.bf16.msrb.mxu0 %v3434_v56 }
  0x64   : > { %v2793_v53 = vld [vmem:[%s4741_s8] sm:$0xf]  ;;  %v3417_v57 = vld [vmem:[%s4756_s29 + $0x4a0] sm:$0xf]  ;;  %v3818_v3 = vor.u32 %v4243_v52, %v3817_v51  ;;  %1916 = vmatpush.bf16.msrb.mxu1 %v3562_v61 }
  0x65   : > { %v3988_v54 = vld [vmem:[%s4741_s8 + $0x1c] sm:$0xf0]  ;;  %v3545_v63 = vld [vmem:[%s4756_s29 + $0x5a0] sm:$0xf]  ;;  %1930 = vmatpush.bf16.msrb.mxu2 %v3690_v62 }
  0x66   : > { %v4143_v58 = vld [vmem:[%s4756_s29 + $0x4ac] sm:$0xf0]  ;;  %v4843_v59 = vor.u32 %v3988_v54, %v2793_v53  ;;  %v3673_v1 = vld [vmem:[%s4756_s29 + $0x6a0] sm:$0xf]  ;;  %1944 = vmatpush.bf16.msrb.mxu3 %v3818_v3 }
  0x67   : > { %v4175_v0 = vld [vmem:[%s4756_s29 + $0x5ac] sm:$0xf0]  ;;  %v3801_v5 = vld [vmem:[%s4756_s29 + $0x7a0] sm:$0xf]  ;;  %v3418_v10 = vor.u32 %v4143_v58, %v3417_v57 }
  0x68   : > { %v4207_v4 = vld [vmem:[%s4756_s29 + $0x6ac] sm:$0xf0]  ;;  %1853 = vmatmul.bf16.vlgmr.msra.gmra.mxu0 %v4843_v59  ;;  %v3546_v13 = vor.u32 %v4175_v0, %v3545_v63  ;;  %v3401_v15 = vld [vmem:[%s4756_s29 + $0x480] sm:$0xf] }
  0x69   : > { %v4239_v6 = vld [vmem:[%s4756_s29 + $0x7ac] sm:$0xf0]  ;;  %v3674_v14 = vor.u32 %v4207_v4, %v3673_v1  ;;  %v3529_v17 = vld [vmem:[%s4756_s29 + $0x580] sm:$0xf]  ;;  %1903 = vmatpush.bf16.msrb.mxu0 %v3418_v10  ;;  %v4021_v10 = vld [vmem:[%s4756_s29 + $0xe4] sm:$0xf] }
  0x6a   : > { %v4139_v16 = vld [vmem:[%s4756_s29 + $0x48c] sm:$0xf0]  ;;  %v3802_v19 = vor.u32 %v4239_v6, %v3801_v5  ;;  %v3657_v21 = vld [vmem:[%s4756_s29 + $0x680] sm:$0xf]  ;;  %1917 = vmatpush.bf16.msrb.mxu1 %v3546_v13  ;;  %v2939_v13 = vld [vmem:[%s4756_s29 + $0xf0] sm:$0xf0] }
  0x6b   : > { %v4171_v20 = vld [vmem:[%s4756_s29 + $0x58c] sm:$0xf0]  ;;  %v3785_v23 = vld [vmem:[%s4756_s29 + $0x780] sm:$0xf]  ;;  %v3402_v25 = vor.u32 %v4139_v16, %v3401_v15  ;;  %1931 = vmatpush.bf16.msrb.mxu2 %v3674_v14  ;;  %v4053_v14 = vld [vmem:[%s4756_s29 + $0x1e4] sm:$0xf] }
  0x6c   : > { %v4203_v22 = vld [vmem:[%s4756_s29 + $0x68c] sm:$0xf0]  ;;  %v3530_v26 = vor.u32 %v4171_v20, %v3529_v17  ;;  %v3385_v28 = vld [vmem:[%s4756_s29 + $0x460] sm:$0xf]  ;;  %1945 = vmatpush.bf16.msrb.mxu3 %v3802_v19  ;;  %v3067_v15 = vld [vmem:[%s4756_s29 + $0x1f0] sm:$0xf0] }
  0x6d   : > { %v4235_v24 = vld [vmem:[%s4756_s29 + $0x78c] sm:$0xf0]  ;;  %v3658_v27 = vor.u32 %v4203_v22, %v3657_v21  ;;  %v3513_v30 = vld [vmem:[%s4756_s29 + $0x560] sm:$0xf]  ;;  %1904 = vmatpush.bf16.msrb.mxu0 %v3402_v25  ;;  %v4085_v16 = vld [vmem:[%s4756_s29 + $0x2e4] sm:$0xf] }
  0x6e   : > { %v4135_v29 = vld [vmem:[%s4756_s29 + $0x46c] sm:$0xf0]  ;;  %v3786_v31 = vor.u32 %v4235_v24, %v3785_v23  ;;  %v3641_v33 = vld [vmem:[%s4756_s29 + $0x660] sm:$0xf]  ;;  %1918 = vmatpush.bf16.msrb.mxu1 %v3530_v26  ;;  %v3195_v17 = vld [vmem:[%s4756_s29 + $0x2f0] sm:$0xf0] }
  0x6f   : > { %v4167_v32 = vld [vmem:[%s4756_s29 + $0x56c] sm:$0xf0]  ;;  %v3769_v35 = vld [vmem:[%s4756_s29 + $0x760] sm:$0xf]  ;;  %v3386_v37 = vor.u32 %v4135_v29, %v3385_v28  ;;  %1932 = vmatpush.bf16.msrb.mxu2 %v3658_v27  ;;  %v4117_v19 = vld [vmem:[%s4756_s29 + $0x3e4] sm:$0xf] }
  0x70   : > { %v4199_v34 = vld [vmem:[%s4756_s29 + $0x66c] sm:$0xf0]  ;;  %v3514_v38 = vor.u32 %v4167_v32, %v3513_v30  ;;  %v3369_v40 = vld [vmem:[%s4756_s29 + $0x440] sm:$0xf]  ;;  %1946 = vmatpush.bf16.msrb.mxu3 %v3786_v31  ;;  %v3323_v21 = vld [vmem:[%s4756_s29 + $0x3f0] sm:$0xf0]  ;;  %v2942_v30 = vor.u32 %v4021_v10, %v2939_v13 }
  0x71   : > { %v4231_v36 = vld [vmem:[%s4756_s29 + $0x76c] sm:$0xf0]  ;;  %v3642_v39 = vor.u32 %v4199_v34, %v3641_v33  ;;  %v3497_v42 = vld [vmem:[%s4756_s29 + $0x540] sm:$0xf]  ;;  %1905 = vmatpush.bf16.msrb.mxu0 %v3386_v37  ;;  %v2817_v26 = vld [vmem:[%s4741_s8 + $0x18] sm:$0xf]  ;;  %v3070_v34 = vor.u32 %v4053_v14, %v3067_v15 }
  0x72   : > { %v4131_v41 = vld [vmem:[%s4756_s29 + $0x44c] sm:$0xf0]  ;;  %v3770_v43 = vor.u32 %v4231_v36, %v3769_v35  ;;  %v3625_v45 = vld [vmem:[%s4756_s29 + $0x640] sm:$0xf]  ;;  %1919 = vmatpush.bf16.msrb.mxu1 %v3514_v38  ;;  %v3991_v27 = vld [vmem:[%s4741_s8 + $0x34] sm:$0xf0]  ;;  %v3198_v35 = vor.u32 %v4085_v16, %v3195_v17 }
  0x73   : > { %v4163_v44 = vld [vmem:[%s4756_s29 + $0x54c] sm:$0xf0]  ;;  %v3753_v47 = vld [vmem:[%s4756_s29 + $0x740] sm:$0xf]  ;;  %v3370_v49 = vor.u32 %v4131_v41, %v3369_v40  ;;  %1933 = vmatpush.bf16.msrb.mxu2 %v3642_v39  ;;  %v3986_v28 = vld [vmem:[%s4741_s8 + $0x14] sm:$0xf]  ;;  %v3326_v39 = vor.u32 %v4117_v19, %v3323_v21 }
  0x74   : > { %v4195_v46 = vld [vmem:[%s4756_s29 + $0x64c] sm:$0xf0]  ;;  %v3353_v50 = vld [vmem:[%s4756_s29 + $0x420] sm:$0xf]  ;;  %v3498_v51 = vor.u32 %v4163_v44, %v3497_v42  ;;  %1947 = vmatpush.bf16.msrb.mxu3 %v3770_v43  ;;  %v2811_v31 = vld [vmem:[%s4741_s8 + $0x30] sm:$0xf0]  ;;  %v4930_v44 = vor.u32 %v3991_v27, %v2817_v26 }
  0x75   : > { %v4227_v48 = vld [vmem:[%s4756_s29 + $0x74c] sm:$0xf0]  ;;  %v3626_v52 = vor.u32 %v4195_v46, %v3625_v45  ;;  %v3481_v54 = vld [vmem:[%s4756_s29 + $0x520] sm:$0xf]  ;;  %1906 = vmatpush.bf16.msrb.mxu0 %v3370_v49  ;;  %v3987_v32 = vld [vmem:[%s4741_s8 + $0x1c] sm:$0xf]  ;;  %v4932_v45 = vor.u32 %v3986_v28, %v2811_v31 }
  0x76   : > { %v4127_v53 = vld [vmem:[%s4756_s29 + $0x42c] sm:$0xf0]  ;;  %v3754_v56 = vor.u32 %v4227_v48, %v3753_v47  ;;  %v3609_v57 = vld [vmem:[%s4756_s29 + $0x620] sm:$0xf]  ;;  %1920 = vmatpush.bf16.msrb.mxu1 %v3498_v51  ;;  %v2819_v33 = vld [vmem:[%s4741_s8 + $0x38] sm:$0xf0] }
  0x77   : > { %v4159_v55 = vld [vmem:[%s4756_s29 + $0x52c] sm:$0xf0]  ;;  %v3737_v60 = vld [vmem:[%s4756_s29 + $0x720] sm:$0xf]  ;;  %v3354_v0 = vor.u32 %v4127_v53, %v3353_v50  ;;  %1934 = vmatpush.bf16.msrb.mxu2 %v3626_v52  ;;  %v4017_v36 = vld [vmem:[%s4756_s29 + $0xc4] sm:$0xf]  ;;  %v4936_v48 = vor.u32 %v3987_v32, %v2819_v33 }
  0x78   : > { %v4191_v58 = vld [vmem:[%s4756_s29 + $0x62c] sm:$0xf0]  ;;  %v3337_v62 = vld [vmem:[%s4756_s29 + $0x400] sm:$0xf]  ;;  %v3482_v6 = vor.u32 %v4159_v55, %v3481_v54  ;;  %1948 = vmatpush.bf16.msrb.mxu3 %v3754_v56  ;;  %v2923_v37 = vld [vmem:[%s4756_s29 + $0xd0] sm:$0xf0] }
  0x79   : > { %v4223_v61 = vld [vmem:[%s4756_s29 + $0x72c] sm:$0xf0]  ;;  %v3465_v1 = vld [vmem:[%s4756_s29 + $0x500] sm:$0xf]  ;;  %v3610_v7 = vor.u32 %v4191_v58, %v3609_v57  ;;  %1907 = vmatpush.bf16.msrb.mxu0 %v3354_v0  ;;  %v4049_v38 = vld [vmem:[%s4756_s29 + $0x1c4] sm:$0xf]  ;;  %v2926_v49 = vor.u32 %v4017_v36, %v2923_v37 }
  0x7a   : > { %v4123_v63 = vld [vmem:[%s4756_s29 + $0x40c] sm:$0xf0]  ;;  %v3593_v4 = vld [vmem:[%s4756_s29 + $0x600] sm:$0xf]  ;;  %v3738_v12 = vor.u32 %v4223_v61, %v3737_v60  ;;  %1921 = vmatpush.bf16.msrb.mxu1 %v3482_v6  ;;  %v3051_v41 = vld [vmem:[%s4756_s29 + $0x1d0] sm:$0xf0] }
  0x7b   : > { %v4155_v3 = vld [vmem:[%s4756_s29 + $0x50c] sm:$0xf0]  ;;  %v3721_v8 = vld [vmem:[%s4756_s29 + $0x700] sm:$0xf]  ;;  %v3338_v20 = vor.u32 %v4123_v63, %v3337_v62  ;;  %1935 = vmatpush.bf16.msrb.mxu2 %v3610_v7  ;;  %v4081_v42 = vld [vmem:[%s4756_s29 + $0x2c4] sm:$0xf]  ;;  %v3054_v50 = vor.u32 %v4049_v38, %v3051_v41 }
  0x7c   : > { %v4187_v5 = vld [vmem:[%s4756_s29 + $0x60c] sm:$0xf0]  ;;  %v2809_v22 = vld [vmem:[%s4741_s8 + $0x10] sm:$0xf]  ;;  %v3466_v24 = vor.u32 %v4155_v3, %v3465_v1  ;;  %1949 = vmatpush.bf16.msrb.mxu3 %v3738_v12  ;;  %v3179_v43 = vld [vmem:[%s4756_s29 + $0x2d0] sm:$0xf0] }
  0x7d   : > { %v4219_v9 = vld [vmem:[%s4756_s29 + $0x70c] sm:$0xf0]  ;;  %v3990_v23 = vld [vmem:[%s4741_s8 + $0x2c] sm:$0xf0]  ;;  %v3594_v25 = vor.u32 %v4187_v5, %v3593_v4  ;;  %1908 = vmatpush.bf16.msrb.mxu0 %v3338_v20  ;;  %v4113_v46 = vld [vmem:[%s4756_s29 + $0x3c4] sm:$0xf]  ;;  %v3182_v51 = vor.u32 %v4081_v42, %v3179_v43 }
  0x7e   : > { %v3722_v29 = vor.u32 %v4219_v9, %v3721_v8  ;;  %v4925_v40 = vor.u32 %v3990_v23, %v2809_v22  ;;  %1922 = vmatpush.bf16.msrb.mxu1 %v3466_v24  ;;  %v3307_v47 = vld [vmem:[%s4756_s29 + $0x3d0] sm:$0xf0]  ;;  %v4013_v52 = vld [vmem:[%s4756_s29 + $0xa4] sm:$0xf] }
  0x7f   : > { %1936 = vmatpush.bf16.msrb.mxu2 %v3594_v25  ;;  %v2907_v53 = vld [vmem:[%s4756_s29 + $0xb0] sm:$0xf0]  ;;  %v4045_v54 = vld [vmem:[%s4756_s29 + $0x1a4] sm:$0xf]  ;;  %v3310_v55 = vor.u32 %v4113_v46, %v3307_v47 }
  0x80   : > { %1950 = vmatpush.bf16.msrb.mxu3 %v3722_v29  ;;  %1909 = vmatmul.bf16.vlgmr.msrb.gmra.mxu0 %v4925_v40  ;;  %v3035_v56 = vld [vmem:[%s4756_s29 + $0x1b0] sm:$0xf0]  ;;  %v4077_v57 = vld [vmem:[%s4756_s29 + $0x2a4] sm:$0xf]  ;;  %v2910_v62 = vor.u32 %v4013_v52, %v2907_v53 }
  0x81   : > { %1957 = vmatpush.bf16.msra.mxu0 %v2942_v30  ;;  %v3163_v58 = vld [vmem:[%s4756_s29 + $0x2b0] sm:$0xf0]  ;;  %1923 = vmatmul.bf16.vlgmr.msrb.gmra.mxu1 %v4932_v45  ;;  %v4109_v60 = vld [vmem:[%s4756_s29 + $0x3a4] sm:$0xf]  ;;  %v3038_v63 = vor.u32 %v4045_v54, %v3035_v56 }
  0x82   : > { %1971 = vmatpush.bf16.msra.mxu1 %v3070_v34  ;;  %1937 = vmatmul.bf16.vlgmr.msrb.gmra.mxu2 %v4930_v44  ;;  %v3291_v61 = vld [vmem:[%s4756_s29 + $0x3b0] sm:$0xf0]  ;;  %v3166_v0 = vor.u32 %v4077_v57, %v3163_v58  ;;  %v4009_v1 = vld [vmem:[%s4756_s29 + $0x84] sm:$0xf] }
  0x83   : > { %1985 = vmatpush.bf16.msra.mxu2 %v3198_v35  ;;  %1951 = vmatmul.bf16.vlgmr.msrb.gmra.mxu3 %v4936_v48  ;;  %v2891_v3 = vld [vmem:[%s4756_s29 + $0x90] sm:$0xf0]  ;;  %v4041_v4 = vld [vmem:[%s4756_s29 + $0x184] sm:$0xf]  ;;  %v3294_v5 = vor.u32 %v4109_v60, %v3291_v61 }
  0x84   : > { %1999 = vmatpush.bf16.msra.mxu3 %v3326_v39  ;;  %v3019_v6 = vld [vmem:[%s4756_s29 + $0x190] sm:$0xf0]  ;;  %v4073_v7 = vld [vmem:[%s4756_s29 + $0x284] sm:$0xf]  ;;  %v2894_v12 = vor.u32 %v4009_v1, %v2891_v3 }
  0x85   : > { %1958 = vmatpush.bf16.msra.mxu0 %v2926_v49  ;;  %v3147_v8 = vld [vmem:[%s4756_s29 + $0x290] sm:$0xf0]  ;;  %v4105_v9 = vld [vmem:[%s4756_s29 + $0x384] sm:$0xf]  ;;  %v3022_v13 = vor.u32 %v4041_v4, %v3019_v6 }
  0x86   : > { %1972 = vmatpush.bf16.msra.mxu1 %v3054_v50  ;;  %v3275_v10 = vld [vmem:[%s4756_s29 + $0x390] sm:$0xf0]  ;;  %v3150_v14 = vor.u32 %v4073_v7, %v3147_v8  ;;  %v4005_v15 = vld [vmem:[%s4756_s29 + $0x64] sm:$0xf] }
  0x87   : > { %1986 = vmatpush.bf16.msra.mxu2 %v3182_v51  ;;  %v2875_v16 = vld [vmem:[%s4756_s29 + $0x70] sm:$0xf0]  ;;  %v4037_v17 = vld [vmem:[%s4756_s29 + $0x164] sm:$0xf]  ;;  %v3278_v19 = vor.u32 %v4105_v9, %v3275_v10 }
  0x88   : > { %2000 = vmatpush.bf16.msra.mxu3 %v3310_v55  ;;  %v3003_v20 = vld [vmem:[%s4756_s29 + $0x170] sm:$0xf0]  ;;  %v4069_v21 = vld [vmem:[%s4756_s29 + $0x264] sm:$0xf]  ;;  %v2878_v25 = vor.u32 %v4005_v15, %v2875_v16 }
  0x89   : > { %1959 = vmatpush.bf16.msra.mxu0 %v2910_v62  ;;  %v3131_v22 = vld [vmem:[%s4756_s29 + $0x270] sm:$0xf0]  ;;  %v4101_v23 = vld [vmem:[%s4756_s29 + $0x364] sm:$0xf]  ;;  %v3006_v26 = vor.u32 %v4037_v17, %v3003_v20 }
  0x8a   : > { %1973 = vmatpush.bf16.msra.mxu1 %v3038_v63  ;;  %v3259_v24 = vld [vmem:[%s4756_s29 + $0x370] sm:$0xf0]  ;;  %v3134_v27 = vor.u32 %v4069_v21, %v3131_v22  ;;  %v4001_v28 = vld [vmem:[%s4756_s29 + $0x44] sm:$0xf] }
  0x8b   : > { %1987 = vmatpush.bf16.msra.mxu2 %v3166_v0  ;;  %v2859_v29 = vld [vmem:[%s4756_s29 + $0x50] sm:$0xf0]  ;;  %v4033_v30 = vld [vmem:[%s4756_s29 + $0x144] sm:$0xf]  ;;  %v3262_v31 = vor.u32 %v4101_v23, %v3259_v24 }
  0x8c   : > { %2001 = vmatpush.bf16.msra.mxu3 %v3294_v5  ;;  %v2987_v32 = vld [vmem:[%s4756_s29 + $0x150] sm:$0xf0]  ;;  %v4065_v33 = vld [vmem:[%s4756_s29 + $0x244] sm:$0xf]  ;;  %v2862_v37 = vor.u32 %v4001_v28, %v2859_v29 }
  0x8d   : > { %1960 = vmatpush.bf16.msra.mxu0 %v2894_v12  ;;  %v3115_v34 = vld [vmem:[%s4756_s29 + $0x250] sm:$0xf0]  ;;  %v4097_v35 = vld [vmem:[%s4756_s29 + $0x344] sm:$0xf]  ;;  %v2990_v38 = vor.u32 %v4033_v30, %v2987_v32 }
  0x8e   : > { %1974 = vmatpush.bf16.msra.mxu1 %v3022_v13  ;;  %v3243_v36 = vld [vmem:[%s4756_s29 + $0x350] sm:$0xf0]  ;;  %v3118_v39 = vor.u32 %v4065_v33, %v3115_v34  ;;  %v3997_v41 = vld [vmem:[%s4756_s29 + $0x24] sm:$0xf] }
  0x8f   : > { %1988 = vmatpush.bf16.msra.mxu2 %v3150_v14  ;;  %v2843_v42 = vld [vmem:[%s4756_s29 + $0x30] sm:$0xf0]  ;;  %v4029_v43 = vld [vmem:[%s4756_s29 + $0x124] sm:$0xf]  ;;  %v3246_v46 = vor.u32 %v4097_v35, %v3243_v36 }
  0x90   : > { %2002 = vmatpush.bf16.msra.mxu3 %v3278_v19  ;;  %v2971_v47 = vld [vmem:[%s4756_s29 + $0x130] sm:$0xf0]  ;;  %v4061_v49 = vld [vmem:[%s4756_s29 + $0x224] sm:$0xf]  ;;  %v2846_v53 = vor.u32 %v3997_v41, %v2843_v42 }
  0x91   : > { %1961 = vmatpush.bf16.msra.mxu0 %v2878_v25  ;;  %v3099_v50 = vld [vmem:[%s4756_s29 + $0x230] sm:$0xf0]  ;;  %v4093_v51 = vld [vmem:[%s4756_s29 + $0x324] sm:$0xf]  ;;  %v2974_v56 = vor.u32 %v4029_v43, %v2971_v47 }
  0x92   : > { %1975 = vmatpush.bf16.msra.mxu1 %v3006_v26  ;;  %v3227_v52 = vld [vmem:[%s4756_s29 + $0x330] sm:$0xf0]  ;;  %v3993_v54 = vld [vmem:[%s4756_s29 + $0x4] sm:$0xf]  ;;  %v3102_v57 = vor.u32 %v4061_v49, %v3099_v50 }
  0x93   : > { %1989 = vmatpush.bf16.msra.mxu2 %v3134_v27  ;;  %v2827_v55 = vld [vmem:[%s4756_s29 + $0x10] sm:$0xf0]  ;;  %v4025_v58 = vld [vmem:[%s4756_s29 + $0x104] sm:$0xf]  ;;  %v3230_v62 = vor.u32 %v4093_v51, %v3227_v52 }
  0x94   : > { %2003 = vmatpush.bf16.msra.mxu3 %v3262_v31  ;;  %v2955_v60 = vld [vmem:[%s4756_s29 + $0x110] sm:$0xf0]  ;;  %v4057_v61 = vld [vmem:[%s4756_s29 + $0x204] sm:$0xf]  ;;  %v2830_v6 = vor.u32 %v3993_v54, %v2827_v55 }
  0x95   : > { %1962 = vmatpush.bf16.msra.mxu0 %v2862_v37  ;;  %v3083_v63 = vld [vmem:[%s4756_s29 + $0x210] sm:$0xf0]  ;;  %v4089_v0 = vld [vmem:[%s4756_s29 + $0x304] sm:$0xf]  ;;  %v2958_v10 = vor.u32 %v4025_v58, %v2955_v60 }
  0x96   : > { %1976 = vmatpush.bf16.msra.mxu1 %v2990_v38  ;;  %v3211_v1 = vld [vmem:[%s4756_s29 + $0x310] sm:$0xf0]  ;;  %v4149_v3 = vld [vmem:[%s4756_s29 + $0x4e4] sm:$0xf]  ;;  %v3086_v12 = vor.u32 %v4057_v61, %v3083_v63 }
  0x97   : > { %1990 = vmatpush.bf16.msra.mxu2 %v3118_v39  ;;  %v3451_v4 = vld [vmem:[%s4756_s29 + $0x4f0] sm:$0xf0]  ;;  %v4181_v5 = vld [vmem:[%s4756_s29 + $0x5e4] sm:$0xf]  ;;  %v3214_v15 = vor.u32 %v4089_v0, %v3211_v1 }
  0x98   : > { %2004 = vmatpush.bf16.msra.mxu3 %v3246_v46  ;;  %v3579_v7 = vld [vmem:[%s4756_s29 + $0x5f0] sm:$0xf0]  ;;  %v4213_v8 = vld [vmem:[%s4756_s29 + $0x6e4] sm:$0xf]  ;;  %v3454_v16 = vor.u32 %v4149_v3, %v3451_v4 }
  0x99   : > { %1963 = vmatpush.bf16.msra.mxu0 %v2846_v53  ;;  %v3707_v9 = vld [vmem:[%s4756_s29 + $0x6f0] sm:$0xf0]  ;;  %v4245_v13 = vld [vmem:[%s4756_s29 + $0x7e4] sm:$0xf]  ;;  %v3582_v17 = vor.u32 %v4181_v5, %v3579_v7 }
  0x9a   : > { %1977 = vmatpush.bf16.msra.mxu1 %v2974_v56  ;;  %v3835_v14 = vld [vmem:[%s4756_s29 + $0x7f0] sm:$0xf0]  ;;  %v3710_v19 = vor.u32 %v4213_v8, %v3707_v9  ;;  %v4145_v20 = vld [vmem:[%s4756_s29 + $0x4c4] sm:$0xf] }
  0x9b   : > { %1991 = vmatpush.bf16.msra.mxu2 %v3102_v57  ;;  %v3435_v21 = vld [vmem:[%s4756_s29 + $0x4d0] sm:$0xf0]  ;;  %v4177_v22 = vld [vmem:[%s4756_s29 + $0x5c4] sm:$0xf]  ;;  %v3838_v23 = vor.u32 %v4245_v13, %v3835_v14 }
  0x9c   : > { %2005 = vmatpush.bf16.msra.mxu3 %v3230_v62  ;;  %v3563_v24 = vld [vmem:[%s4756_s29 + $0x5d0] sm:$0xf0]  ;;  %v4209_v25 = vld [vmem:[%s4756_s29 + $0x6c4] sm:$0xf]  ;;  %v3438_v29 = vor.u32 %v4145_v20, %v3435_v21 }
  0x9d   : > { %1964 = vmatpush.bf16.msra.mxu0 %v2830_v6  ;;  %v3691_v26 = vld [vmem:[%s4756_s29 + $0x6d0] sm:$0xf0]  ;;  %v4241_v27 = vld [vmem:[%s4756_s29 + $0x7c4] sm:$0xf]  ;;  %v3566_v30 = vor.u32 %v4177_v22, %v3563_v24 }
  0x9e   : > { %1978 = vmatpush.bf16.msra.mxu1 %v2958_v10  ;;  %v3819_v28 = vld [vmem:[%s4756_s29 + $0x7d0] sm:$0xf0]  ;;  %v3694_v31 = vor.u32 %v4209_v25, %v3691_v26  ;;  %v4141_v32 = vld [vmem:[%s4756_s29 + $0x4a4] sm:$0xf] }
  0x9f   : > { %1992 = vmatpush.bf16.msra.mxu2 %v3086_v12  ;;  %v3419_v33 = vld [vmem:[%s4756_s29 + $0x4b0] sm:$0xf0]  ;;  %v4173_v34 = vld [vmem:[%s4756_s29 + $0x5a4] sm:$0xf]  ;;  %v3822_v35 = vor.u32 %v4241_v27, %v3819_v28 }
  0xa0   : > { %2006 = vmatpush.bf16.msra.mxu3 %v3214_v15  ;;  %v3547_v36 = vld [vmem:[%s4756_s29 + $0x5b0] sm:$0xf0]  ;;  %v4205_v37 = vld [vmem:[%s4756_s29 + $0x6a4] sm:$0xf]  ;;  %1965 = vmatmul.bf16.vlgmr.msra.gmra.mxu0 %v4843_v59  ;;  %v3422_v42 = vor.u32 %v4141_v32, %v3419_v33 }
  0xa1   : > { %2013 = vmatpush.bf16.msrb.mxu0 %v3454_v16  ;;  %v3675_v38 = vld [vmem:[%s4756_s29 + $0x6b0] sm:$0xf0]  ;;  %v4237_v39 = vld [vmem:[%s4756_s29 + $0x7a4] sm:$0xf]  ;;  %1979 = vmatmul.bf16.vlgmr.msra.gmra.mxu1 %v4859_v11  ;;  %v3550_v43 = vor.u32 %v4173_v34, %v3547_v36 }
  0xa2   : > { %2027 = vmatpush.bf16.msrb.mxu1 %v3582_v17  ;;  %v3803_v41 = vld [vmem:[%s4756_s29 + $0x7b0] sm:$0xf0]  ;;  %1993 = vmatmul.bf16.vlgmr.msra.gmra.mxu2 %v4849_v2  ;;  %v3678_v46 = vor.u32 %v4205_v37, %v3675_v38  ;;  %v4137_v47 = vld [vmem:[%s4756_s29 + $0x484] sm:$0xf] }
  0xa3   : > { %2041 = vmatpush.bf16.msrb.mxu2 %v3710_v19  ;;  %2007 = vmatmul.bf16.vlgmr.msra.gmra.mxu3 %v4865_v18  ;;  %v3403_v49 = vld [vmem:[%s4756_s29 + $0x490] sm:$0xf0]  ;;  %v4169_v50 = vld [vmem:[%s4756_s29 + $0x584] sm:$0xf]  ;;  %v3806_v51 = vor.u32 %v4237_v39, %v3803_v41 }
  0xa4   : > { %2055 = vmatpush.bf16.msrb.mxu3 %v3838_v23  ;;  %v3531_v52 = vld [vmem:[%s4756_s29 + $0x590] sm:$0xf0]  ;;  %v4201_v53 = vld [vmem:[%s4756_s29 + $0x684] sm:$0xf]  ;;  %v3406_v57 = vor.u32 %v4137_v47, %v3403_v49  ;;  %v2945_v49 = vld [vmem:[%s4756_s29 + $0xe8] sm:$0xf] }
  0xa5   : > { %2014 = vmatpush.bf16.msrb.mxu0 %v3438_v29  ;;  %v3659_v54 = vld [vmem:[%s4756_s29 + $0x690] sm:$0xf0]  ;;  %v4233_v55 = vld [vmem:[%s4756_s29 + $0x784] sm:$0xf]  ;;  %v3534_v58 = vor.u32 %v4169_v50, %v3531_v52  ;;  %v4024_v50 = vld [vmem:[%s4756_s29 + $0xf4] sm:$0xf0] }
  0xa6   : > { %2028 = vmatpush.bf16.msrb.mxu1 %v3566_v30  ;;  %v3787_v56 = vld [vmem:[%s4756_s29 + $0x790] sm:$0xf0]  ;;  %v3662_v60 = vor.u32 %v4201_v53, %v3659_v54  ;;  %v4133_v61 = vld [vmem:[%s4756_s29 + $0x464] sm:$0xf]  ;;  %v4056_v53 = vld [vmem:[%s4756_s29 + $0x1f4] sm:$0xf0] }
  0xa7   : > { %2042 = vmatpush.bf16.msrb.mxu2 %v3694_v31  ;;  %v3387_v62 = vld [vmem:[%s4756_s29 + $0x470] sm:$0xf0]  ;;  %v4165_v63 = vld [vmem:[%s4756_s29 + $0x564] sm:$0xf]  ;;  %v3790_v0 = vor.u32 %v4233_v55, %v3787_v56  ;;  %v3201_v54 = vld [vmem:[%s4756_s29 + $0x2e8] sm:$0xf] }
  0xa8   : > { %2056 = vmatpush.bf16.msrb.mxu3 %v3822_v35  ;;  %v3515_v1 = vld [vmem:[%s4756_s29 + $0x570] sm:$0xf0]  ;;  %v4197_v3 = vld [vmem:[%s4756_s29 + $0x664] sm:$0xf]  ;;  %v3390_v7 = vor.u32 %v4133_v61, %v3387_v62  ;;  %v4088_v55 = vld [vmem:[%s4756_s29 + $0x2f4] sm:$0xf0]  ;;  %v2946_v62 = vor.u32 %v4024_v50, %v2945_v49 }
  0xa9   : > { %2015 = vmatpush.bf16.msrb.mxu0 %v3422_v42  ;;  %v3643_v4 = vld [vmem:[%s4756_s29 + $0x670] sm:$0xf0]  ;;  %v4229_v5 = vld [vmem:[%s4756_s29 + $0x764] sm:$0xf]  ;;  %v3518_v8 = vor.u32 %v4165_v63, %v3515_v1  ;;  %v2929_v1 = vld [vmem:[%s4756_s29 + $0xc8] sm:$0xf] }
  0xaa   : > { %2029 = vmatpush.bf16.msrb.mxu1 %v3550_v43  ;;  %v3771_v6 = vld [vmem:[%s4756_s29 + $0x770] sm:$0xf0]  ;;  %v3646_v9 = vor.u32 %v4197_v3, %v3643_v4  ;;  %v4129_v10 = vld [vmem:[%s4756_s29 + $0x444] sm:$0xf]  ;;  %v4020_v3 = vld [vmem:[%s4756_s29 + $0xd4] sm:$0xf0] }
  0xab   : > { %2043 = vmatpush.bf16.msrb.mxu2 %v3678_v46  ;;  %v3371_v12 = vld [vmem:[%s4756_s29 + $0x450] sm:$0xf0]  ;;  %v4161_v13 = vld [vmem:[%s4756_s29 + $0x544] sm:$0xf]  ;;  %v3774_v14 = vor.u32 %v4229_v5, %v3771_v6  ;;  %v3057_v4 = vld [vmem:[%s4756_s29 + $0x1c8] sm:$0xf] }
  0xac   : > { %2057 = vmatpush.bf16.msrb.mxu3 %v3806_v51  ;;  %v3499_v15 = vld [vmem:[%s4756_s29 + $0x550] sm:$0xf0]  ;;  %v4193_v16 = vld [vmem:[%s4756_s29 + $0x644] sm:$0xf]  ;;  %v3374_v21 = vor.u32 %v4129_v10, %v3371_v12  ;;  %v3073_v51 = vld [vmem:[%s4756_s29 + $0x1e8] sm:$0xf]  ;;  %v2930_v12 = vor.u32 %v4020_v3, %v2929_v1 }
  0xad   : > { %2016 = vmatpush.bf16.msrb.mxu0 %v3406_v57  ;;  %v3627_v17 = vld [vmem:[%s4756_s29 + $0x650] sm:$0xf0]  ;;  %v4225_v19 = vld [vmem:[%s4756_s29 + $0x744] sm:$0xf]  ;;  %v3502_v22 = vor.u32 %v4161_v13, %v3499_v15  ;;  %v3074_v63 = vor.u32 %v4056_v53, %v3073_v51  ;;  %v4052_v6 = vld [vmem:[%s4756_s29 + $0x1d4] sm:$0xf0] }
  0xae   : > { %2030 = vmatpush.bf16.msrb.mxu1 %v3534_v58  ;;  %v3755_v20 = vld [vmem:[%s4756_s29 + $0x750] sm:$0xf0]  ;;  %v3630_v23 = vor.u32 %v4193_v16, %v3627_v17  ;;  %v4125_v24 = vld [vmem:[%s4756_s29 + $0x424] sm:$0xf]  ;;  %v3329_v58 = vld [vmem:[%s4756_s29 + $0x3e8] sm:$0xf]  ;;  %v3058_v13 = vor.u32 %v4052_v6, %v3057_v4 }
  0xaf   : > { %2044 = vmatpush.bf16.msrb.mxu2 %v3662_v60  ;;  %v3355_v25 = vld [vmem:[%s4756_s29 + $0x430] sm:$0xf0]  ;;  %v4157_v26 = vld [vmem:[%s4756_s29 + $0x524] sm:$0xf]  ;;  %v3758_v27 = vor.u32 %v4225_v19, %v3755_v20  ;;  %v4120_v60 = vld [vmem:[%s4756_s29 + $0x3f4] sm:$0xf0] }
  0xb0   : > { %2058 = vmatpush.bf16.msrb.mxu3 %v3790_v0  ;;  %v3483_v28 = vld [vmem:[%s4756_s29 + $0x530] sm:$0xf0]  ;;  %v4189_v29 = vld [vmem:[%s4756_s29 + $0x624] sm:$0xf]  ;;  %v3358_v33 = vor.u32 %v4125_v24, %v3355_v25  ;;  %v3202_v0 = vor.u32 %v4088_v55, %v3201_v54  ;;  %v3330_v5 = vor.u32 %v4120_v60, %v3329_v58  ;;  %v4116_v10 = vld [vmem:[%s4756_s29 + $0x3d4] sm:$0xf0] }
  0xb1   : > { %2017 = vmatpush.bf16.msrb.mxu0 %v3390_v7  ;;  %v3611_v30 = vld [vmem:[%s4756_s29 + $0x630] sm:$0xf0]  ;;  %v4221_v31 = vld [vmem:[%s4756_s29 + $0x724] sm:$0xf]  ;;  %v3486_v36 = vor.u32 %v4157_v26, %v3483_v28  ;;  %v3185_v7 = vld [vmem:[%s4756_s29 + $0x2c8] sm:$0xf] }
  0xb2   : > { %2031 = vmatpush.bf16.msrb.mxu1 %v3518_v8  ;;  %v3739_v32 = vld [vmem:[%s4756_s29 + $0x730] sm:$0xf0]  ;;  %v4121_v34 = vld [vmem:[%s4756_s29 + $0x404] sm:$0xf]  ;;  %v3614_v37 = vor.u32 %v4189_v29, %v3611_v30  ;;  %v4084_v8 = vld [vmem:[%s4756_s29 + $0x2d4] sm:$0xf0] }
  0xb3   : > { %2045 = vmatpush.bf16.msrb.mxu2 %v3646_v9  ;;  %v3339_v35 = vld [vmem:[%s4756_s29 + $0x410] sm:$0xf0]  ;;  %v4153_v38 = vld [vmem:[%s4756_s29 + $0x504] sm:$0xf]  ;;  %v3742_v42 = vor.u32 %v4221_v31, %v3739_v32  ;;  %v3313_v9 = vld [vmem:[%s4756_s29 + $0x3c8] sm:$0xf] }
  0xb4   : > { %2059 = vmatpush.bf16.msrb.mxu3 %v3774_v14  ;;  %v3467_v39 = vld [vmem:[%s4756_s29 + $0x510] sm:$0xf0]  ;;  %v4185_v41 = vld [vmem:[%s4756_s29 + $0x604] sm:$0xf]  ;;  %v3342_v52 = vor.u32 %v4121_v34, %v3339_v35  ;;  %v3186_v14 = vor.u32 %v4084_v8, %v3185_v7  ;;  %v2913_v15 = vld [vmem:[%s4756_s29 + $0xa8] sm:$0xf]  ;;  %v3314_v19 = vor.u32 %v4116_v10, %v3313_v9 }
  0xb5   : > { %2018 = vmatpush.bf16.msrb.mxu0 %v3374_v21  ;;  %v3595_v43 = vld [vmem:[%s4756_s29 + $0x610] sm:$0xf0]  ;;  %v4217_v46 = vld [vmem:[%s4756_s29 + $0x704] sm:$0xf]  ;;  %v3470_v56 = vor.u32 %v4153_v38, %v3467_v39  ;;  %v4016_v16 = vld [vmem:[%s4756_s29 + $0xb4] sm:$0xf0] }
  0xb6   : > { %2032 = vmatpush.bf16.msrb.mxu1 %v3502_v22  ;;  %v3723_v47 = vld [vmem:[%s4756_s29 + $0x710] sm:$0xf0]  ;;  %v3598_v57 = vor.u32 %v4185_v41, %v3595_v43  ;;  %v3041_v17 = vld [vmem:[%s4756_s29 + $0x1a8] sm:$0xf]  ;;  %v4048_v20 = vld [vmem:[%s4756_s29 + $0x1b4] sm:$0xf0]  ;;  %v2914_v25 = vor.u32 %v4016_v16, %v2913_v15 }
  0xb7   : > { %2046 = vmatpush.bf16.msrb.mxu2 %v3630_v23  ;;  %v3726_v61 = vor.u32 %v4217_v46, %v3723_v47  ;;  %v3169_v21 = vld [vmem:[%s4756_s29 + $0x2a8] sm:$0xf]  ;;  %v4080_v22 = vld [vmem:[%s4756_s29 + $0x2b4] sm:$0xf0]  ;;  %v3042_v26 = vor.u32 %v4048_v20, %v3041_v17 }
  0xb8   : > { %2060 = vmatpush.bf16.msrb.mxu3 %v3758_v27  ;;  %v3297_v23 = vld [vmem:[%s4756_s29 + $0x3a8] sm:$0xf]  ;;  %v4112_v24 = vld [vmem:[%s4756_s29 + $0x3b4] sm:$0xf0]  ;;  %v3170_v27 = vor.u32 %v4080_v22, %v3169_v21 }
  0xb9   : > { %2019 = vmatpush.bf16.msrb.mxu0 %v3358_v33  ;;  %v2897_v28 = vld [vmem:[%s4756_s29 + $0x88] sm:$0xf]  ;;  %v4012_v29 = vld [vmem:[%s4756_s29 + $0x94] sm:$0xf0]  ;;  %v3298_v31 = vor.u32 %v4112_v24, %v3297_v23 }
  0xba   : > { %2033 = vmatpush.bf16.msrb.mxu1 %v3486_v36  ;;  %v3025_v30 = vld [vmem:[%s4756_s29 + $0x188] sm:$0xf]  ;;  %v4044_v32 = vld [vmem:[%s4756_s29 + $0x194] sm:$0xf0] }
  0xbb   : > { %2047 = vmatpush.bf16.msrb.mxu2 %v3614_v37  ;;  %v3153_v33 = vld [vmem:[%s4756_s29 + $0x288] sm:$0xf]  ;;  %v4076_v34 = vld [vmem:[%s4756_s29 + $0x294] sm:$0xf0]  ;;  %v2898_v37 = vor.u32 %v4012_v29, %v2897_v28  ;;  %v3026_v38 = vor.u32 %v4044_v32, %v3025_v30 }
  0xbc   : > { %2061 = vmatpush.bf16.msrb.mxu3 %v3742_v42  ;;  %v3281_v35 = vld [vmem:[%s4756_s29 + $0x388] sm:$0xf]  ;;  %v4108_v36 = vld [vmem:[%s4756_s29 + $0x394] sm:$0xf0]  ;;  %v3154_v39 = vor.u32 %v4076_v34, %v3153_v33 }
  0xbd   : > { %2020 = vmatpush.bf16.msrb.mxu0 %v3342_v52  ;;  %v2881_v41 = vld [vmem:[%s4756_s29 + $0x68] sm:$0xf]  ;;  %v4008_v42 = vld [vmem:[%s4756_s29 + $0x74] sm:$0xf0]  ;;  %v3282_v46 = vor.u32 %v4108_v36, %v3281_v35 }
  0xbe   : > { %2034 = vmatpush.bf16.msrb.mxu1 %v3470_v56  ;;  %v3009_v43 = vld [vmem:[%s4756_s29 + $0x168] sm:$0xf]  ;;  %v4040_v47 = vld [vmem:[%s4756_s29 + $0x174] sm:$0xf0]  ;;  %v2882_v53 = vor.u32 %v4008_v42, %v2881_v41 }
  0xbf   : > { %2048 = vmatpush.bf16.msrb.mxu2 %v3598_v57  ;;  %v3137_v49 = vld [vmem:[%s4756_s29 + $0x268] sm:$0xf]  ;;  %v4072_v50 = vld [vmem:[%s4756_s29 + $0x274] sm:$0xf0]  ;;  %v3010_v54 = vor.u32 %v4040_v47, %v3009_v43 }
  0xc0   : > { %2062 = vmatpush.bf16.msrb.mxu3 %v3726_v61  ;;  %2021 = vmatmul.bf16.vlgmr.msrb.gmra.mxu0 %v4925_v40  ;;  %v3265_v51 = vld [vmem:[%s4756_s29 + $0x368] sm:$0xf]  ;;  %v4104_v52 = vld [vmem:[%s4756_s29 + $0x374] sm:$0xf0]  ;;  %v3138_v55 = vor.u32 %v4072_v50, %v3137_v49 }
  0xc1   : > { %2069 = vmatpush.bf16.msra.mxu0 %v2946_v62  ;;  %2035 = vmatmul.bf16.vlgmr.msrb.gmra.mxu1 %v4932_v45  ;;  %v2865_v56 = vld [vmem:[%s4756_s29 + $0x48] sm:$0xf]  ;;  %v4004_v57 = vld [vmem:[%s4756_s29 + $0x54] sm:$0xf0]  ;;  %v3266_v60 = vor.u32 %v4104_v52, %v3265_v51 }
  0xc2   : > { %2083 = vmatpush.bf16.msra.mxu1 %v3074_v63  ;;  %2049 = vmatmul.bf16.vlgmr.msrb.gmra.mxu2 %v4930_v44  ;;  %v2993_v58 = vld [vmem:[%s4756_s29 + $0x148] sm:$0xf]  ;;  %v4036_v61 = vld [vmem:[%s4756_s29 + $0x154] sm:$0xf0]  ;;  %v2866_v3 = vor.u32 %v4004_v57, %v2865_v56 }
  0xc3   : > { %2097 = vmatpush.bf16.msra.mxu2 %v3202_v0  ;;  %2063 = vmatmul.bf16.vlgmr.msrb.gmra.mxu3 %v4936_v48  ;;  %v3121_v62 = vld [vmem:[%s4756_s29 + $0x248] sm:$0xf]  ;;  %v4068_v63 = vld [vmem:[%s4756_s29 + $0x254] sm:$0xf0]  ;;  %v2994_v4 = vor.u32 %v4036_v61, %v2993_v58 }
  0xc4   : > { %2111 = vmatpush.bf16.msra.mxu3 %v3330_v5  ;;  %v3249_v0 = vld [vmem:[%s4756_s29 + $0x348] sm:$0xf]  ;;  %v4100_v1 = vld [vmem:[%s4756_s29 + $0x354] sm:$0xf0]  ;;  %v3122_v5 = vor.u32 %v4068_v63, %v3121_v62 }
  0xc5   : > { %2070 = vmatpush.bf16.msra.mxu0 %v2930_v12  ;;  %v2849_v6 = vld [vmem:[%s4756_s29 + $0x28] sm:$0xf]  ;;  %v4000_v7 = vld [vmem:[%s4756_s29 + $0x34] sm:$0xf0]  ;;  %v3250_v9 = vor.u32 %v4100_v1, %v3249_v0 }
  0xc6   : > { %2084 = vmatpush.bf16.msra.mxu1 %v3058_v13  ;;  %v2977_v8 = vld [vmem:[%s4756_s29 + $0x128] sm:$0xf]  ;;  %v4032_v10 = vld [vmem:[%s4756_s29 + $0x134] sm:$0xf0]  ;;  %v2850_v16 = vor.u32 %v4000_v7, %v2849_v6 }
  0xc7   : > { %2098 = vmatpush.bf16.msra.mxu2 %v3186_v14  ;;  %v3105_v12 = vld [vmem:[%s4756_s29 + $0x228] sm:$0xf]  ;;  %v4064_v13 = vld [vmem:[%s4756_s29 + $0x234] sm:$0xf0]  ;;  %v2978_v20 = vor.u32 %v4032_v10, %v2977_v8 }
  0xc8   : > { %2112 = vmatpush.bf16.msra.mxu3 %v3314_v19  ;;  %v3233_v14 = vld [vmem:[%s4756_s29 + $0x328] sm:$0xf]  ;;  %v4096_v15 = vld [vmem:[%s4756_s29 + $0x334] sm:$0xf0]  ;;  %v3106_v21 = vor.u32 %v4064_v13, %v3105_v12 }
  0xc9   : > { %2071 = vmatpush.bf16.msra.mxu0 %v2914_v25  ;;  %v2833_v17 = vld [vmem:[%s4756_s29 + $0x8] sm:$0xf]  ;;  %v3996_v19 = vld [vmem:[%s4756_s29 + $0x14] sm:$0xf0]  ;;  %v3234_v25 = vor.u32 %v4096_v15, %v3233_v14 }
  0xca   : > { %2085 = vmatpush.bf16.msra.mxu1 %v3042_v26  ;;  %v2961_v22 = vld [vmem:[%s4756_s29 + $0x108] sm:$0xf]  ;;  %v4028_v23 = vld [vmem:[%s4756_s29 + $0x114] sm:$0xf0]  ;;  %v2834_v32 = vor.u32 %v3996_v19, %v2833_v17 }
  0xcb   : > { %2099 = vmatpush.bf16.msra.mxu2 %v3170_v27  ;;  %v3089_v24 = vld [vmem:[%s4756_s29 + $0x208] sm:$0xf]  ;;  %v4060_v26 = vld [vmem:[%s4756_s29 + $0x214] sm:$0xf0]  ;;  %v2962_v36 = vor.u32 %v4028_v23, %v2961_v22 }
  0xcc   : > { %2113 = vmatpush.bf16.msra.mxu3 %v3298_v31  ;;  %v3217_v27 = vld [vmem:[%s4756_s29 + $0x308] sm:$0xf]  ;;  %v4092_v28 = vld [vmem:[%s4756_s29 + $0x314] sm:$0xf0] }
  0xcd   : > { %2072 = vmatpush.bf16.msra.mxu0 %v2898_v37  ;;  %v3457_v29 = vld [vmem:[%s4756_s29 + $0x4e8] sm:$0xf]  ;;  %v4152_v30 = vld [vmem:[%s4756_s29 + $0x4f4] sm:$0xf0]  ;;  %v3090_v37 = vor.u32 %v4060_v26, %v3089_v24  ;;  %v3218_v41 = vor.u32 %v4092_v28, %v3217_v27 }
  0xce   : > { %2086 = vmatpush.bf16.msra.mxu1 %v3026_v38  ;;  %v3585_v31 = vld [vmem:[%s4756_s29 + $0x5e8] sm:$0xf]  ;;  %v4184_v33 = vld [vmem:[%s4756_s29 + $0x5f4] sm:$0xf0]  ;;  %v3458_v42 = vor.u32 %v4152_v30, %v3457_v29 }
  0xcf   : > { %2100 = vmatpush.bf16.msra.mxu2 %v3154_v39  ;;  %v3713_v34 = vld [vmem:[%s4756_s29 + $0x6e8] sm:$0xf]  ;;  %v4216_v35 = vld [vmem:[%s4756_s29 + $0x6f4] sm:$0xf0]  ;;  %v3586_v43 = vor.u32 %v4184_v33, %v3585_v31 }
  0xd0   : > { %2114 = vmatpush.bf16.msra.mxu3 %v3282_v46  ;;  %v3841_v38 = vld [vmem:[%s4756_s29 + $0x7e8] sm:$0xf]  ;;  %v4248_v39 = vld [vmem:[%s4756_s29 + $0x7f4] sm:$0xf0]  ;;  %v3714_v46 = vor.u32 %v4216_v35, %v3713_v34 }
  0xd1   : > { %2073 = vmatpush.bf16.msra.mxu0 %v2882_v53  ;;  %v3441_v47 = vld [vmem:[%s4756_s29 + $0x4c8] sm:$0xf]  ;;  %v4148_v49 = vld [vmem:[%s4756_s29 + $0x4d4] sm:$0xf0]  ;;  %v3842_v51 = vor.u32 %v4248_v39, %v3841_v38 }
  0xd2   : > { %2087 = vmatpush.bf16.msra.mxu1 %v3010_v54  ;;  %v3569_v50 = vld [vmem:[%s4756_s29 + $0x5c8] sm:$0xf]  ;;  %v4180_v52 = vld [vmem:[%s4756_s29 + $0x5d4] sm:$0xf0]  ;;  %v3442_v57 = vor.u32 %v4148_v49, %v3441_v47 }
  0xd3   : > { %2101 = vmatpush.bf16.msra.mxu2 %v3138_v55  ;;  %v3697_v53 = vld [vmem:[%s4756_s29 + $0x6c8] sm:$0xf]  ;;  %v4212_v54 = vld [vmem:[%s4756_s29 + $0x6d4] sm:$0xf0]  ;;  %v3570_v58 = vor.u32 %v4180_v52, %v3569_v50 }
  0xd4   : > { %2115 = vmatpush.bf16.msra.mxu3 %v3266_v60  ;;  %v3825_v55 = vld [vmem:[%s4756_s29 + $0x7c8] sm:$0xf]  ;;  %v4244_v56 = vld [vmem:[%s4756_s29 + $0x7d4] sm:$0xf0]  ;;  %v3698_v60 = vor.u32 %v4212_v54, %v3697_v53 }
  0xd5   : > { %2074 = vmatpush.bf16.msra.mxu0 %v2866_v3  ;;  %v3425_v61 = vld [vmem:[%s4756_s29 + $0x4a8] sm:$0xf]  ;;  %v4144_v62 = vld [vmem:[%s4756_s29 + $0x4b4] sm:$0xf0]  ;;  %v3826_v0 = vor.u32 %v4244_v56, %v3825_v55 }
  0xd6   : > { %2088 = vmatpush.bf16.msra.mxu1 %v2994_v4  ;;  %v3553_v63 = vld [vmem:[%s4756_s29 + $0x5a8] sm:$0xf]  ;;  %v4176_v1 = vld [vmem:[%s4756_s29 + $0x5b4] sm:$0xf0]  ;;  %v3426_v7 = vor.u32 %v4144_v62, %v3425_v61 }
  0xd7   : > { %2102 = vmatpush.bf16.msra.mxu2 %v3122_v5  ;;  %v3681_v3 = vld [vmem:[%s4756_s29 + $0x6a8] sm:$0xf]  ;;  %v4208_v4 = vld [vmem:[%s4756_s29 + $0x6b4] sm:$0xf0]  ;;  %v3554_v8 = vor.u32 %v4176_v1, %v3553_v63 }
  0xd8   : > { %2116 = vmatpush.bf16.msra.mxu3 %v3250_v9  ;;  %v3809_v5 = vld [vmem:[%s4756_s29 + $0x7a8] sm:$0xf]  ;;  %v4240_v6 = vld [vmem:[%s4756_s29 + $0x7b4] sm:$0xf0]  ;;  %v3682_v9 = vor.u32 %v4208_v4, %v3681_v3 }
  0xd9   : > { %2075 = vmatpush.bf16.msra.mxu0 %v2850_v16  ;;  %v3409_v10 = vld [vmem:[%s4756_s29 + $0x488] sm:$0xf]  ;;  %v4140_v12 = vld [vmem:[%s4756_s29 + $0x494] sm:$0xf0]  ;;  %v3810_v14 = vor.u32 %v4240_v6, %v3809_v5 }
  0xda   : > { %2089 = vmatpush.bf16.msra.mxu1 %v2978_v20  ;;  %v3537_v13 = vld [vmem:[%s4756_s29 + $0x588] sm:$0xf]  ;;  %v4172_v15 = vld [vmem:[%s4756_s29 + $0x594] sm:$0xf0] }
  0xdb   : > { %2103 = vmatpush.bf16.msra.mxu2 %v3106_v21  ;;  %v3665_v16 = vld [vmem:[%s4756_s29 + $0x688] sm:$0xf]  ;;  %v4204_v17 = vld [vmem:[%s4756_s29 + $0x694] sm:$0xf0]  ;;  %v3410_v21 = vor.u32 %v4140_v12, %v3409_v10  ;;  %v3538_v22 = vor.u32 %v4172_v15, %v3537_v13  ;;  %v4022_v12 = vld [vmem:[%s4756_s29 + $0xec] sm:$0xf] }
  0xdc   : > { %2117 = vmatpush.bf16.msra.mxu3 %v3234_v25  ;;  %v3793_v19 = vld [vmem:[%s4756_s29 + $0x788] sm:$0xf]  ;;  %v4236_v20 = vld [vmem:[%s4756_s29 + $0x794] sm:$0xf0]  ;;  %v3666_v23 = vor.u32 %v4204_v17, %v3665_v16  ;;  %v2947_v13 = vld [vmem:[%s4756_s29 + $0xf8] sm:$0xf0] }
  0xdd   : > { %2076 = vmatpush.bf16.msra.mxu0 %v2834_v32  ;;  %v3393_v24 = vld [vmem:[%s4756_s29 + $0x468] sm:$0xf]  ;;  %v4136_v25 = vld [vmem:[%s4756_s29 + $0x474] sm:$0xf0]  ;;  %v3794_v27 = vor.u32 %v4236_v20, %v3793_v19  ;;  %v3075_v16 = vld [vmem:[%s4756_s29 + $0x1f8] sm:$0xf0] }
  0xde   : > { %2090 = vmatpush.bf16.msra.mxu1 %v2962_v36  ;;  %v3521_v26 = vld [vmem:[%s4756_s29 + $0x568] sm:$0xf]  ;;  %v4168_v28 = vld [vmem:[%s4756_s29 + $0x574] sm:$0xf0]  ;;  %v3394_v33 = vor.u32 %v4136_v25, %v3393_v24  ;;  %v4086_v17 = vld [vmem:[%s4756_s29 + $0x2ec] sm:$0xf]  ;;  %v2950_v25 = vor.u32 %v4022_v12, %v2947_v13 }
  0xdf   : > { %2104 = vmatpush.bf16.msra.mxu2 %v3090_v37  ;;  %v3649_v29 = vld [vmem:[%s4756_s29 + $0x668] sm:$0xf]  ;;  %v4200_v30 = vld [vmem:[%s4756_s29 + $0x674] sm:$0xf0]  ;;  %v3522_v34 = vor.u32 %v4168_v28, %v3521_v26  ;;  %v3203_v19 = vld [vmem:[%s4756_s29 + $0x2f8] sm:$0xf0] }
  0xe0   : > { %2118 = vmatpush.bf16.msra.mxu3 %v3218_v41  ;;  %2077 = vmatmul.bf16.vlgmr.msra.gmra.mxu0 %v4843_v59  ;;  %v3777_v31 = vld [vmem:[%s4756_s29 + $0x768] sm:$0xf]  ;;  %v4232_v32 = vld [vmem:[%s4756_s29 + $0x774] sm:$0xf0]  ;;  %v3650_v35 = vor.u32 %v4200_v30, %v3649_v29  ;;  %v4018_v28 = vld [vmem:[%s4756_s29 + $0xcc] sm:$0xf] }
  0xe1   : > { %2125 = vmatpush.bf16.msrb.mxu0 %v3458_v42  ;;  %2091 = vmatmul.bf16.vlgmr.msra.gmra.mxu1 %v4859_v11  ;;  %v3377_v36 = vld [vmem:[%s4756_s29 + $0x448] sm:$0xf]  ;;  %v4132_v37 = vld [vmem:[%s4756_s29 + $0x454] sm:$0xf0]  ;;  %v3778_v39 = vor.u32 %v4232_v32, %v3777_v31  ;;  %v2931_v29 = vld [vmem:[%s4756_s29 + $0xd8] sm:$0xf0] }
  0xe2   : > { %2139 = vmatpush.bf16.msrb.mxu1 %v3586_v43  ;;  %2105 = vmatmul.bf16.vlgmr.msra.gmra.mxu2 %v4849_v2  ;;  %v3505_v38 = vld [vmem:[%s4756_s29 + $0x548] sm:$0xf]  ;;  %v4164_v41 = vld [vmem:[%s4756_s29 + $0x554] sm:$0xf0]  ;;  %v3378_v49 = vor.u32 %v4132_v37, %v3377_v36  ;;  %v4050_v30 = vld [vmem:[%s4756_s29 + $0x1cc] sm:$0xf]  ;;  %v2934_v37 = vor.u32 %v4018_v28, %v2931_v29 }
  0xe3   : > { %2153 = vmatpush.bf16.msrb.mxu2 %v3714_v46  ;;  %2119 = vmatmul.bf16.vlgmr.msra.gmra.mxu3 %v4865_v18  ;;  %v3633_v42 = vld [vmem:[%s4756_s29 + $0x648] sm:$0xf]  ;;  %v4196_v43 = vld [vmem:[%s4756_s29 + $0x654] sm:$0xf0]  ;;  %v3506_v50 = vor.u32 %v4164_v41, %v3505_v38  ;;  %v3059_v32 = vld [vmem:[%s4756_s29 + $0x1d8] sm:$0xf0] }
  0xe4   : > { %2167 = vmatpush.bf16.msrb.mxu3 %v3842_v51  ;;  %v3761_v46 = vld [vmem:[%s4756_s29 + $0x748] sm:$0xf]  ;;  %v4228_v47 = vld [vmem:[%s4756_s29 + $0x754] sm:$0xf0]  ;;  %v3634_v51 = vor.u32 %v4196_v43, %v3633_v42  ;;  %v3315_v36 = vld [vmem:[%s4756_s29 + $0x3d8] sm:$0xf0]  ;;  %v3062_v38 = vor.u32 %v4050_v30, %v3059_v32 }
  0xe5   : > { %2126 = vmatpush.bf16.msrb.mxu0 %v3442_v57  ;;  %v3361_v52 = vld [vmem:[%s4756_s29 + $0x428] sm:$0xf]  ;;  %v4128_v53 = vld [vmem:[%s4756_s29 + $0x434] sm:$0xf0]  ;;  %v3762_v55 = vor.u32 %v4228_v47, %v3761_v46  ;;  %v4014_v41 = vld [vmem:[%s4756_s29 + $0xac] sm:$0xf] }
  0xe6   : > { %2140 = vmatpush.bf16.msrb.mxu1 %v3570_v58  ;;  %v3489_v54 = vld [vmem:[%s4756_s29 + $0x528] sm:$0xf]  ;;  %v4160_v56 = vld [vmem:[%s4756_s29 + $0x534] sm:$0xf0]  ;;  %v3362_v62 = vor.u32 %v4128_v53, %v3361_v52  ;;  %v2915_v42 = vld [vmem:[%s4756_s29 + $0xb8] sm:$0xf0] }
  0xe7   : > { %2154 = vmatpush.bf16.msrb.mxu2 %v3698_v60  ;;  %v3617_v57 = vld [vmem:[%s4756_s29 + $0x628] sm:$0xf]  ;;  %v4192_v58 = vld [vmem:[%s4756_s29 + $0x634] sm:$0xf0]  ;;  %v3490_v1 = vor.u32 %v4160_v56, %v3489_v54  ;;  %v4046_v43 = vld [vmem:[%s4756_s29 + $0x1ac] sm:$0xf]  ;;  %v2918_v53 = vor.u32 %v4014_v41, %v2915_v42 }
  0xe8   : > { %2168 = vmatpush.bf16.msrb.mxu3 %v3826_v0  ;;  %v3745_v60 = vld [vmem:[%s4756_s29 + $0x728] sm:$0xf]  ;;  %v4224_v61 = vld [vmem:[%s4756_s29 + $0x734] sm:$0xf0]  ;;  %v3618_v3 = vor.u32 %v4192_v58, %v3617_v57  ;;  %v3043_v47 = vld [vmem:[%s4756_s29 + $0x1b8] sm:$0xf0] }
  0xe9   : > { %2127 = vmatpush.bf16.msrb.mxu0 %v3426_v7  ;;  %v3345_v63 = vld [vmem:[%s4756_s29 + $0x408] sm:$0xf]  ;;  %v4124_v0 = vld [vmem:[%s4756_s29 + $0x414] sm:$0xf0]  ;;  %v3746_v7 = vor.u32 %v4224_v61, %v3745_v60  ;;  %v3299_v52 = vld [vmem:[%s4756_s29 + $0x3b8] sm:$0xf0]  ;;  %v3046_v54 = vor.u32 %v4046_v43, %v3043_v47 }
  0xea   : > { %2141 = vmatpush.bf16.msrb.mxu1 %v3554_v8  ;;  %v3473_v4 = vld [vmem:[%s4756_s29 + $0x508] sm:$0xf]  ;;  %v4156_v5 = vld [vmem:[%s4756_s29 + $0x514] sm:$0xf0]  ;;  %v3346_v15 = vor.u32 %v4124_v0, %v3345_v63  ;;  %v4010_v56 = vld [vmem:[%s4756_s29 + $0x8c] sm:$0xf] }
  0xeb   : > { %2155 = vmatpush.bf16.msrb.mxu2 %v3682_v9  ;;  %v3601_v6 = vld [vmem:[%s4756_s29 + $0x608] sm:$0xf]  ;;  %v4188_v8 = vld [vmem:[%s4756_s29 + $0x614] sm:$0xf0]  ;;  %v3474_v20 = vor.u32 %v4156_v5, %v3473_v4  ;;  %v2899_v57 = vld [vmem:[%s4756_s29 + $0x98] sm:$0xf0]  ;;  %v5230_v4 = vpop.f32.mrf.mxu0 }
  0xec   : > { %2169 = vmatpush.bf16.msrb.mxu3 %v3810_v14  ;;  %v3729_v9 = vld [vmem:[%s4756_s29 + $0x708] sm:$0xf]  ;;  %v4220_v10 = vld [vmem:[%s4756_s29 + $0x714] sm:$0xf0]  ;;  %v4054_v14 = vld [vmem:[%s4756_s29 + $0x1ec] sm:$0xf] }
  0xed   : > { %2128 = vmatpush.bf16.msrb.mxu0 %v3410_v21  ;;  %v3602_v21 = vor.u32 %v4188_v8, %v3601_v6  ;;  %v3730_v24 = vor.u32 %v4220_v10, %v3729_v9  ;;  %v3078_v26 = vor.u32 %v4054_v14, %v3075_v16  ;;  %v4042_v58 = vld [vmem:[%s4756_s29 + $0x18c] sm:$0xf]  ;;  %v3027_v61 = vld [vmem:[%s4756_s29 + $0x198] sm:$0xf0]  ;;  %v5235_v10 = vpop.f32.mrf.mxu1 }
  0xee   : > { %2142 = vmatpush.bf16.msrb.mxu1 %v3538_v22  ;;  %v4118_v22 = vld [vmem:[%s4756_s29 + $0x3ec] sm:$0xf]  ;;  %v3155_v63 = vld [vmem:[%s4756_s29 + $0x298] sm:$0xf0]  ;;  %v3030_v5 = vor.u32 %v4042_v58, %v3027_v61 }
  0xef   : > { %2156 = vmatpush.bf16.msrb.mxu2 %v3666_v23  ;;  %v3331_v23 = vld [vmem:[%s4756_s29 + $0x3f8] sm:$0xf0]  ;;  %v4106_v0 = vld [vmem:[%s4756_s29 + $0x38c] sm:$0xf] }
  0xf0   : > { %2170 = vmatpush.bf16.msrb.mxu3 %v3794_v27  ;;  %v3206_v27 = vor.u32 %v4086_v17, %v3203_v19  ;;  %v3334_v31 = vor.u32 %v4118_v22, %v3331_v23  ;;  %v2883_v8 = vld [vmem:[%s4756_s29 + $0x78] sm:$0xf0]  ;;  %v4038_v9 = vld [vmem:[%s4756_s29 + $0x16c] sm:$0xf] }
  0xf1   : > { %2129 = vmatpush.bf16.msrb.mxu0 %v3394_v33  ;;  %v4082_v33 = vld [vmem:[%s4756_s29 + $0x2cc] sm:$0xf]  ;;  %v3011_v13 = vld [vmem:[%s4756_s29 + $0x178] sm:$0xf0] }
  0xf2   : > { %2143 = vmatpush.bf16.msrb.mxu1 %v3522_v34  ;;  %v3187_v34 = vld [vmem:[%s4756_s29 + $0x2d8] sm:$0xf0]  ;;  %v4070_v14 = vld [vmem:[%s4756_s29 + $0x26c] sm:$0xf] }
  0xf3   : > { %2157 = vmatpush.bf16.msrb.mxu2 %v3650_v35  ;;  %v4114_v35 = vld [vmem:[%s4756_s29 + $0x3cc] sm:$0xf]  ;;  %v3267_v17 = vld [vmem:[%s4756_s29 + $0x378] sm:$0xf0] }
  0xf4   : > { %2171 = vmatpush.bf16.msrb.mxu3 %v3778_v39  ;;  %v3190_v39 = vor.u32 %v4082_v33, %v3187_v34  ;;  %v3318_v46 = vor.u32 %v4114_v35, %v3315_v36  ;;  %v4102_v16 = vld [vmem:[%s4756_s29 + $0x36c] sm:$0xf]  ;;  %v2867_v23 = vld [vmem:[%s4756_s29 + $0x58] sm:$0xf0]  ;;  %v5252_v33 = vpop.f32.mrf.mxu3 }
  0xf5   : > { %2130 = vmatpush.bf16.msrb.mxu0 %v3378_v49  ;;  %v4078_v49 = vld [vmem:[%s4756_s29 + $0x2ac] sm:$0xf]  ;;  %v3123_v28 = vld [vmem:[%s4756_s29 + $0x258] sm:$0xf0] }
  0xf6   : > { %2144 = vmatpush.bf16.msrb.mxu1 %v3506_v50  ;;  %v3171_v50 = vld [vmem:[%s4756_s29 + $0x2b8] sm:$0xf0]  ;;  %v4002_v22 = vld [vmem:[%s4756_s29 + $0x4c] sm:$0xf] }
  0xf7   : > { %2158 = vmatpush.bf16.msrb.mxu2 %v3634_v51  ;;  %v4110_v51 = vld [vmem:[%s4756_s29 + $0x3ac] sm:$0xf]  ;;  %v3251_v30 = vld [vmem:[%s4756_s29 + $0x358] sm:$0xf0]  ;;  %v2870_v32 = vor.u32 %v4002_v22, %v2867_v23 }
  0xf8   : > { %2172 = vmatpush.bf16.msrb.mxu3 %v3762_v55  ;;  %v3174_v55 = vor.u32 %v4078_v49, %v3171_v50  ;;  %v3302_v60 = vor.u32 %v4110_v51, %v3299_v52  ;;  %v4098_v29 = vld [vmem:[%s4756_s29 + $0x34c] sm:$0xf]  ;;  %v2979_v41 = vld [vmem:[%s4756_s29 + $0x138] sm:$0xf0]  ;;  %v5264_v50 = vpop.f32.mrf.mxu1 }
  0xf9   : > { %2131 = vmatpush.bf16.msrb.mxu0 %v3362_v62  ;;  %v4074_v62 = vld [vmem:[%s4756_s29 + $0x28c] sm:$0xf]  ;;  %v3107_v43 = vld [vmem:[%s4756_s29 + $0x238] sm:$0xf0] }
  0xfa   : > { %2145 = vmatpush.bf16.msrb.mxu1 %v3490_v1  ;;  %v3283_v1 = vld [vmem:[%s4756_s29 + $0x398] sm:$0xf0]  ;;  %v3158_v6 = vor.u32 %v4074_v62, %v3155_v63  ;;  %v3998_v36 = vld [vmem:[%s4756_s29 + $0x2c] sm:$0xf] }
  0xfb   : > { %2159 = vmatpush.bf16.msrb.mxu2 %v3618_v3  ;;  %v2902_v3 = vor.u32 %v4010_v56, %v2899_v57  ;;  %v3286_v12 = vor.u32 %v4106_v0, %v3283_v1  ;;  %v4062_v42 = vld [vmem:[%s4756_s29 + $0x22c] sm:$0xf]  ;;  %v3235_v49 = vld [vmem:[%s4756_s29 + $0x338] sm:$0xf0] }
  0xfc   : > { %2173 = vmatpush.bf16.msrb.mxu3 %v3746_v7  ;;  %v4006_v7 = vld [vmem:[%s4756_s29 + $0x6c] sm:$0xf]  ;;  %v2963_v57 = vld [vmem:[%s4756_s29 + $0x118] sm:$0xf0] }
  0xfd   : > { %2132 = vmatpush.bf16.msrb.mxu0 %v3346_v15  ;;  %v3139_v15 = vld [vmem:[%s4756_s29 + $0x278] sm:$0xf0]  ;;  %v2886_v19 = vor.u32 %v4006_v7, %v2883_v8  ;;  %v4094_v47 = vld [vmem:[%s4756_s29 + $0x32c] sm:$0xf] }
  0xfe   : > { %2146 = vmatpush.bf16.msrb.mxu1 %v3474_v20  ;;  %v3014_v20 = vor.u32 %v4038_v9, %v3011_v13  ;;  %v3994_v52 = vld [vmem:[%s4756_s29 + $0xc] sm:$0xf]  ;;  %v3091_v61 = vld [vmem:[%s4756_s29 + $0x218] sm:$0xf0] }
  0xff   : > { %2160 = vmatpush.bf16.msrb.mxu2 %v3602_v21  ;;  %v3142_v21 = vor.u32 %v4070_v14, %v3139_v15  ;;  %v4026_v56 = vld [vmem:[%s4756_s29 + $0x10c] sm:$0xf]  ;;  %v3219_v63 = vld [vmem:[%s4756_s29 + $0x318] sm:$0xf0] }
 0x100   : > { %2174 = vmatpush.bf16.msrb.mxu3 %v3730_v24  ;;  %2133 = vmatmul.bf16.vlgmr.msrb.gmra.mxu0 %v4925_v40  ;;  %v4034_v24 = vld [vmem:[%s4756_s29 + $0x14c] sm:$0xf]  ;;  %v3459_v1 = vld [vmem:[%s4756_s29 + $0x4f8] sm:$0xf0]  ;;  %v2966_v9 = vor.u32 %v4026_v56, %v2963_v57 }
 0x101   : > { %2181 = vmatpush.bf16.msra.mxu0 %v2950_v25  ;;  %2147 = vmatmul.bf16.vlgmr.msrb.gmra.mxu1 %v4932_v45  ;;  %v3270_v25 = vor.u32 %v4102_v16, %v3267_v17  ;;  %v4058_v58 = vld [vmem:[%s4756_s29 + $0x20c] sm:$0xf]  ;;  %v3715_v8 = vld [vmem:[%s4756_s29 + $0x6f8] sm:$0xf0] }
 0x102   : > { %2195 = vmatpush.bf16.msra.mxu1 %v3078_v26  ;;  %2161 = vmatmul.bf16.vlgmr.msrb.gmra.mxu2 %v4930_v44  ;;  %v2995_v26 = vld [vmem:[%s4756_s29 + $0x158] sm:$0xf0]  ;;  %v4090_v62 = vld [vmem:[%s4756_s29 + $0x30c] sm:$0xf] }
 0x103   : > { %2209 = vmatpush.bf16.msra.mxu2 %v3206_v27  ;;  %2175 = vmatmul.bf16.vlgmr.msrb.gmra.mxu3 %v4936_v48  ;;  %v4066_v27 = vld [vmem:[%s4756_s29 + $0x24c] sm:$0xf]  ;;  %v2998_v34 = vor.u32 %v4034_v24, %v2995_v26  ;;  %v3843_v14 = vld [vmem:[%s4756_s29 + $0x7f8] sm:$0xf0]  ;;  %v3222_v16 = vor.u32 %v4090_v62, %v3219_v63 }
 0x104   : > { %2223 = vmatpush.bf16.msra.mxu3 %v3334_v31  ;;  %v5250_v31 = vpop.f32.mrf.mxu2  ;;  %v3126_v35 = vor.u32 %v4066_v27, %v3123_v28  ;;  %v4150_v0 = vld [vmem:[%s4756_s29 + $0x4ec] sm:$0xf]  ;;  %v3443_v23 = vld [vmem:[%s4756_s29 + $0x4d8] sm:$0xf0] }
 0x105   : > { %2182 = vmatpush.bf16.msra.mxu0 %v2934_v37  ;;  %v2851_v37 = vld [vmem:[%s4756_s29 + $0x38] sm:$0xf0]  ;;  %v4214_v7 = vld [vmem:[%s4756_s29 + $0x6ec] sm:$0xf]  ;;  %v3462_v17 = vor.u32 %v4150_v0, %v3459_v1 }
 0x106   : > { %2196 = vmatpush.bf16.msra.mxu1 %v3062_v38  ;;  %v4030_v38 = vld [vmem:[%s4756_s29 + $0x12c] sm:$0xf]  ;;  %v2854_v51 = vor.u32 %v3998_v36, %v2851_v37  ;;  %v3571_v26 = vld [vmem:[%s4756_s29 + $0x5d8] sm:$0xf0] }
 0x107   : > { %2210 = vmatpush.bf16.msra.mxu2 %v3190_v39  ;;  %v3254_v39 = vor.u32 %v4098_v29, %v3251_v30  ;;  %v4246_v13 = vld [vmem:[%s4756_s29 + $0x7ec] sm:$0xf]  ;;  %v3699_v28 = vld [vmem:[%s4756_s29 + $0x6d8] sm:$0xf0] }
 0x108   : > { %2224 = vmatpush.bf16.msra.mxu3 %v3318_v46  ;;  %v5260_v46 = vpop.f32.mrf.mxu0  ;;  %v4146_v22 = vld [vmem:[%s4756_s29 + $0x4cc] sm:$0xf]  ;;  %v3411_v56 = vld [vmem:[%s4756_s29 + $0x498] sm:$0xf0] }
 0x109   : > { %2183 = vmatpush.bf16.msra.mxu0 %v2918_v53  ;;  %v2835_v53 = vld [vmem:[%s4756_s29 + $0x18] sm:$0xf0]  ;;  %v4178_v24 = vld [vmem:[%s4756_s29 + $0x5cc] sm:$0xf] }
 0x10a   : > { %2197 = vmatpush.bf16.msra.mxu1 %v3046_v54  ;;  %v2982_v54 = vor.u32 %v4030_v38, %v2979_v41  ;;  %v4210_v27 = vld [vmem:[%s4756_s29 + $0x6cc] sm:$0xf]  ;;  %v3574_v36 = vor.u32 %v4178_v24, %v3571_v26  ;;  %v3795_v63 = vld [vmem:[%s4756_s29 + $0x798] sm:$0xf0] }
 0x10b   : > { %2211 = vmatpush.bf16.msra.mxu2 %v3174_v55  ;;  %v3110_v55 = vor.u32 %v4062_v42, %v3107_v43  ;;  %v4242_v30 = vld [vmem:[%s4756_s29 + $0x7cc] sm:$0xf]  ;;  %v3702_v37 = vor.u32 %v4210_v27, %v3699_v28  ;;  %v3555_v43 = vld [vmem:[%s4756_s29 + $0x5b8] sm:$0xf0] }
 0x10c   : > { %2225 = vmatpush.bf16.msra.mxu3 %v3302_v60  ;;  %v3238_v60 = vor.u32 %v4094_v47, %v3235_v49  ;;  %v5282_v15 = vpop.f32.mrf.mxu2  ;;  %v4142_v38 = vld [vmem:[%s4756_s29 + $0x4ac] sm:$0xf]  ;;  %v3683_v49 = vld [vmem:[%s4756_s29 + $0x6b8] sm:$0xf0] }
 0x10d   : > { %2184 = vmatpush.bf16.msra.mxu0 %v2902_v3  ;;  %v4182_v3 = vld [vmem:[%s4756_s29 + $0x5ec] sm:$0xf]  ;;  %v3507_v28 = vld [vmem:[%s4756_s29 + $0x558] sm:$0xf0] }
 0x10e   : > { %2198 = vmatpush.bf16.msra.mxu1 %v3030_v5  ;;  %v2838_v5 = vor.u32 %v3994_v52, %v2835_v53  ;;  %v4174_v41 = vld [vmem:[%s4756_s29 + $0x5ac] sm:$0xf]  ;;  %v3811_v52 = vld [vmem:[%s4756_s29 + $0x7b8] sm:$0xf0] }
 0x10f   : > { %2212 = vmatpush.bf16.msra.mxu2 %v3158_v6  ;;  %v3587_v6 = vld [vmem:[%s4756_s29 + $0x5f8] sm:$0xf0]  ;;  %v4206_v47 = vld [vmem:[%s4756_s29 + $0x6ac] sm:$0xf] }
 0x110   : > { %2226 = vmatpush.bf16.msra.mxu3 %v3286_v12  ;;  %v3094_v12 = vor.u32 %v4058_v58, %v3091_v61  ;;  %v5292_v29 = vpop.f32.mrf.mxu0  ;;  %v3539_v58 = vld [vmem:[%s4756_s29 + $0x598] sm:$0xf0]  ;;  %v4130_v24 = vld [vmem:[%s4756_s29 + $0x44c] sm:$0xf] }
 0x111   : > { %2185 = vmatpush.bf16.msra.mxu0 %v2886_v19  ;;  %v5284_v19 = vpop.f32.mrf.mxu3  ;;  %v3667_v61 = vld [vmem:[%s4756_s29 + $0x698] sm:$0xf0]  ;;  %v4162_v26 = vld [vmem:[%s4756_s29 + $0x54c] sm:$0xf] }
 0x112   : > { %2199 = vmatpush.bf16.msra.mxu1 %v3014_v20  ;;  %v3590_v20 = vor.u32 %v4182_v3, %v3587_v6  ;;  %v4134_v6 = vld [vmem:[%s4756_s29 + $0x46c] sm:$0xf] }
 0x113   : > { %2213 = vmatpush.bf16.msra.mxu2 %v3142_v21  ;;  %v3718_v21 = vor.u32 %v4214_v7, %v3715_v8  ;;  %v3395_v7 = vld [vmem:[%s4756_s29 + $0x478] sm:$0xf0]  ;;  %v4166_v8 = vld [vmem:[%s4756_s29 + $0x56c] sm:$0xf] }
 0x114   : > { %2227 = vmatpush.bf16.msra.mxu3 %v3270_v25  ;;  %v3846_v25 = vor.u32 %v4246_v13, %v3843_v14  ;;  %v5313_v57 = vpop.f32.mrf.mxu2  ;;  %v3523_v13 = vld [vmem:[%s4756_s29 + $0x578] sm:$0xf0]  ;;  %v4198_v14 = vld [vmem:[%s4756_s29 + $0x66c] sm:$0xf] }
 0x115   : > { %2186 = vmatpush.bf16.msra.mxu0 %v2870_v32  ;;  %v3827_v32 = vld [vmem:[%s4756_s29 + $0x7d8] sm:$0xf0] }
 0x116   : > { %2200 = vmatpush.bf16.msra.mxu1 %v2998_v34  ;;  %v5296_v34 = vpop.f32.mrf.mxu1  ;;  %v3830_v42 = vor.u32 %v4242_v30, %v3827_v32  ;;  %v4194_v30 = vld [vmem:[%s4756_s29 + $0x64c] sm:$0xf]  ;;  %v3635_v32 = vld [vmem:[%s4756_s29 + $0x658] sm:$0xf0] }
 0x117   : > { %2214 = vmatpush.bf16.msra.mxu2 %v3126_v35  ;;  %v3446_v35 = vor.u32 %v4146_v22, %v3443_v23  ;;  %v3526_v22 = vor.u32 %v4166_v8, %v3523_v13  ;;  %v3731_v8 = vld [vmem:[%s4756_s29 + $0x718] sm:$0xf0] }
 0x118   : > { %2228 = vmatpush.bf16.msra.mxu3 %v3254_v39  ;;  %v3427_v39 = vld [vmem:[%s4756_s29 + $0x4b8] sm:$0xf0]  ;;  %v5322_v1 = vpop.f32.mrf.mxu0 }
 0x119   : > { %2187 = vmatpush.bf16.msra.mxu0 %v2854_v51  ;;  %v4238_v51 = vld [vmem:[%s4756_s29 + $0x7ac] sm:$0xf]  ;;  %v3430_v53 = vor.u32 %v4142_v38, %v3427_v39  ;;  %v5318_v62 = vpop.f32.mrf.mxu3 }
 0x11a   : > { %2201 = vmatpush.bf16.msra.mxu1 %v2982_v54  ;;  %v3686_v54 = vor.u32 %v4206_v47, %v3683_v49  ;;  %v4126_v47 = vld [vmem:[%s4756_s29 + $0x42c] sm:$0xf]  ;;  %v3363_v49 = vld [vmem:[%s4756_s29 + $0x438] sm:$0xf0] }
 0x11b   : > { %2215 = vmatpush.bf16.msra.mxu2 %v3110_v55  ;;  %v4138_v55 = vld [vmem:[%s4756_s29 + $0x48c] sm:$0xf] }
 0x11c   : > { %2229 = vmatpush.bf16.msra.mxu3 %v3238_v60  ;;  %v4202_v60 = vld [vmem:[%s4756_s29 + $0x68c] sm:$0xf]  ;;  %v3414_v0 = vor.u32 %v4138_v55, %v3411_v56 }
 0x11d   : > { %2188 = vmatpush.bf16.msra.mxu0 %v2838_v5  ;;  %v3670_v5 = vor.u32 %v4202_v60, %v3667_v61  ;;  %v4222_v56 = vld [vmem:[%s4756_s29 + $0x72c] sm:$0xf] }
 0x11e   : > { %2202 = vmatpush.bf16.msra.mxu1 %v2966_v9  ;;  %v5327_v9 = vpop.f32.mrf.mxu1  ;;  %v4122_v61 = vld [vmem:[%s4756_s29 + $0x40c] sm:$0xf] }
 0x11f   : > { %2216 = vmatpush.bf16.msra.mxu2 %v3094_v12 }
 0x120   : > { %2230 = vmatpush.bf16.msra.mxu3 %v3222_v16  ;;  %2189 = vmatmul.bf16.vlgmr.msra.gmra.mxu0 %v4843_v59  ;;  %v3814_v59 = vor.u32 %v4238_v51, %v3811_v52  ;;  %v3651_v16 = vld [vmem:[%s4756_s29 + $0x678] sm:$0xf0]  ;;  %v4158_v51 = vld [vmem:[%s4756_s29 + $0x52c] sm:$0xf] }
 0x121   : > { %2237 = vmatpush.bf16.msrb.mxu0 %v3462_v17  ;;  %2203 = vmatmul.bf16.vlgmr.msra.gmra.mxu1 %v4859_v11  ;;  %v4234_v11 = vld [vmem:[%s4756_s29 + $0x78c] sm:$0xf]  ;;  %v3654_v23 = vor.u32 %v4198_v14, %v3651_v16  ;;  %v5344_v39 = vpop.f32.mrf.mxu3 }
 0x122   : > { %2251 = vmatpush.bf16.msrb.mxu1 %v3590_v20  ;;  %2217 = vmatmul.bf16.vlgmr.msra.gmra.mxu2 %v4849_v2  ;;  %v3558_v2 = vor.u32 %v4174_v41, %v3555_v43  ;;  %v3798_v12 = vor.u32 %v4234_v11, %v3795_v63  ;;  %v4230_v17 = vld [vmem:[%s4756_s29 + $0x76c] sm:$0xf]  ;;  %v3779_v20 = vld [vmem:[%s4756_s29 + $0x778] sm:$0xf0]  ;;  %v3510_v41 = vor.u32 %v4162_v26, %v3507_v28  ;;  %v1966_v43 = vpop.f32.mrf.mxu0 }
 0x123   : > { %2265 = vmatpush.bf16.msrb.mxu2 %v3718_v21  ;;  %2231 = vmatmul.bf16.vlgmr.msra.gmra.mxu3 %v4865_v18  ;;  %v4170_v18 = vld [vmem:[%s4756_s29 + $0x58c] sm:$0xf]  ;;  %v3398_v21 = vor.u32 %v4134_v6, %v3395_v7  ;;  %v3782_v27 = vor.u32 %v4230_v17, %v3779_v20  ;;  %v3347_v11 = vld [vmem:[%s4756_s29 + $0x418] sm:$0xf0]  ;;  %v1871_v28 = vadd.f32 %v5264_v50, %v5260_v46 }
 0x124   : > { %2279 = vmatpush.bf16.msrb.mxu3 %v3846_v25  ;;  %v3542_v3 = vor.u32 %v4170_v18, %v3539_v58  ;;  %v3379_v25 = vld [vmem:[%s4756_s29 + $0x458] sm:$0xf0]  ;;  %v4154_v63 = vld [vmem:[%s4756_s29 + $0x50c] sm:$0xf] }
 0x125   : > { %2238 = vmatpush.bf16.msrb.mxu0 %v3446_v35  ;;  %v4226_v35 = vld [vmem:[%s4756_s29 + $0x74c] sm:$0xf]  ;;  %v3382_v38 = vor.u32 %v4130_v24, %v3379_v25  ;;  %v3747_v18 = vld [vmem:[%s4756_s29 + $0x738] sm:$0xf0]  ;;  %v1869_v25 = vadd.f32 %v5235_v10, %v5230_v4  ;;  %v1885_v46 = vadd.f32 %v5282_v15, %v1871_v28 }
 0x126   : > { %2252 = vmatpush.bf16.msrb.mxu1 %v3574_v36  ;;  %v3763_v36 = vld [vmem:[%s4756_s29 + $0x758] sm:$0xf0]  ;;  %v1980_v55 = vpop.f32.mrf.mxu1  ;;  %v4218_v7 = vld [vmem:[%s4756_s29 + $0x70c] sm:$0xf] }
 0x127   : > { %2266 = vmatpush.bf16.msrb.mxu2 %v3702_v37  ;;  %v5342_v37 = vpop.f32.mrf.mxu2  ;;  %v3766_v52 = vor.u32 %v4226_v35, %v3763_v36  ;;  %v3603_v6 = vld [vmem:[%s4756_s29 + $0x618] sm:$0xf0]  ;;  %v3734_v20 = vor.u32 %v4218_v7, %v3731_v8  ;;  %v1981_v26 = vadd.f32 %v1980_v55, %v1966_v43  ;;  %v1883_v4 = vadd.f32 %v5250_v31, %v1869_v25  ;;  %v4263_v50 = vld [vmem:[%s5363_s26 + $0x68] sm:$0xff]  ;;  %v4254_v31 = vld [vmem:[%s5363_s26 + $0x20] sm:$0xff] }
 0x128   : > { %2280 = vmatpush.bf16.msrb.mxu3 %v3830_v42  ;;  %v3638_v42 = vor.u32 %v4194_v30, %v3635_v32  ;;  %v4264_v30 = vld [vmem:[%s5363_s26 + $0x70] sm:$0xff]  ;;  %v4255_v32 = vld [vmem:[%s5363_s26 + $0x28] sm:$0xff] }
 0x129   : > { %2239 = vmatpush.bf16.msrb.mxu0 %v3430_v53  ;;  %v3491_v53 = vld [vmem:[%s4756_s29 + $0x538] sm:$0xf0]  ;;  %v2008_v17 = vpop.f32.mrf.mxu3  ;;  %v4268_v25 = vld [vmem:[%s5363_s26 + $0x90] sm:$0xff] }
 0x12a   : > { %2253 = vmatpush.bf16.msrb.mxu1 %v3558_v2  ;;  %v4190_v2 = vld [vmem:[%s4756_s29 + $0x62c] sm:$0xf]  ;;  %v3494_v58 = vor.u32 %v4158_v51, %v3491_v53  ;;  %v4261_v51 = vld [vmem:[%s5363_s26 + $0x58] sm:$0xff] }
 0x12b   : > { %2267 = vmatpush.bf16.msrb.mxu2 %v3686_v54  ;;  %v3619_v54 = vld [vmem:[%s4756_s29 + $0x638] sm:$0xf0] }
 0x12c   : > { %2281 = vmatpush.bf16.msrb.mxu3 %v3814_v59  ;;  %v3366_v59 = vor.u32 %v4126_v47, %v3363_v49  ;;  %v3622_v60 = vor.u32 %v4190_v2, %v3619_v54 }
 0x12d   : > { %2240 = vmatpush.bf16.msrb.mxu0 %v3414_v0  ;;  %v3750_v0 = vor.u32 %v4222_v56, %v3747_v18  ;;  %v4252_v56 = vld [vmem:[%s5363_s26 + $0x10] sm:$0xff] }
 0x12e   : > { %2254 = vmatpush.bf16.msrb.mxu1 %v3542_v3  ;;  %v3475_v3 = vld [vmem:[%s4756_s29 + $0x518] sm:$0xf0]  ;;  %v1982_v24 = vpop.f32.mrf.mxu1 }
 0x12f   : > { %2268 = vmatpush.bf16.msrb.mxu2 %v3670_v5  ;;  %v4186_v5 = vld [vmem:[%s4756_s29 + $0x60c] sm:$0xf]  ;;  %v1994_v13 = vpop.f32.mrf.mxu2  ;;  %v3478_v14 = vor.u32 %v4154_v63, %v3475_v3 }
 0x130   : > { %2282 = vmatpush.bf16.msrb.mxu3 %v3798_v12  ;;  %v3350_v12 = vor.u32 %v4122_v61, %v3347_v11  ;;  %v3606_v16 = vor.u32 %v4186_v5, %v3603_v6  ;;  %v1995_v10 = vadd.f32 %v1994_v13, %v1981_v26  ;;  %v4251_v11 = vld [vmem:[%s5363_s26 + $0x8] sm:$0xff] }
 0x131   : > { %2241 = vmatpush.bf16.msrb.mxu0 %v3398_v21  ;;  %v4257_v21 = vld [vmem:[%s5363_s26 + $0x38] sm:$0xff]  ;;  %v4259_v3 = vld [vmem:[%s5363_s26 + $0x48] sm:$0xff] }
 0x132   : > { %2255 = vmatpush.bf16.msrb.mxu1 %v3526_v22  ;;  %v1968_v22 = vpop.f32.mrf.mxu0  ;;  %v2009_v36 = vadd.f32 %v2008_v17, %v1995_v10 }
 0x133   : > { %2269 = vmatpush.bf16.msrb.mxu2 %v3654_v23  ;;  %v4265_v23 = vld [vmem:[%s5363_s26 + $0x78] sm:$0xff] }
 0x134   : > { %2283 = vmatpush.bf16.msrb.mxu3 %v3782_v27  ;;  %v4256_v27 = vld [vmem:[%s5363_s26 + $0x30] sm:$0xff] }
 0x135   : > { %2242 = vmatpush.bf16.msrb.mxu0 %v3382_v38 }
 0x136   : > { %2256 = vmatpush.bf16.msrb.mxu1 %v3510_v41 }
 0x137   : > { %2270 = vmatpush.bf16.msrb.mxu2 %v3638_v42  ;;  %v1996_v35 = vpop.f32.mrf.mxu2  ;;  %v4262_v42 = vld [vmem:[%s5363_s26 + $0x60] sm:$0xff] }
 0x138   : > { %2284 = vmatpush.bf16.msrb.mxu3 %v3766_v52 }
 0x139   : > { %2243 = vmatpush.bf16.msrb.mxu0 %v3366_v59 }
 0x13a   : > { %2257 = vmatpush.bf16.msrb.mxu1 %v3494_v58  ;;  %v4260_v58 = vld [vmem:[%s5363_s26 + $0x50] sm:$0xff] }
 0x13b   : > { %2271 = vmatpush.bf16.msrb.mxu2 %v3622_v60  ;;  %v4272_v60 = vld [vmem:[%s5363_s26 + $0xb0] sm:$0xff] }
 0x13c   : > { %2285 = vmatpush.bf16.msrb.mxu3 %v3750_v0 }
 0x13d   : > { %2244 = vmatpush.bf16.msrb.mxu0 %v3350_v12  ;;  %v2022_v38 = vpop.f32.mrf.mxu0  ;;  %v4250_v12 = vld [vmem:[%s5363_s26] sm:$0xff] }
 0x13e   : > { %2258 = vmatpush.bf16.msrb.mxu1 %v3478_v14  ;;  %v2036_v41 = vpop.f32.mrf.mxu1  ;;  %v2023_v49 = vadd.f32 %v2022_v38, %v2009_v36  ;;  %v4258_v14 = vld [vmem:[%s5363_s26 + $0x40] sm:$0xff] }
 0x13f   : > { %2272 = vmatpush.bf16.msrb.mxu2 %v3606_v16 }
 0x140   : > { %2286 = vmatpush.bf16.msrb.mxu3 %v3734_v20  ;;  %2245 = vmatmul.bf16.vlgmr.msrb.gmra.mxu0 %v4925_v40  ;;  %v2010_v40 = vpop.f32.mrf.mxu3  ;;  %v2037_v54 = vadd.f32 %v2036_v41, %v2023_v49 }
 0x141   : > { %2566 = vmatpush.bf16.msra.mxu0 %v4257_v21  ;;  %2259 = vmatmul.bf16.vlgmr.msrb.gmra.mxu1 %v4932_v45  ;;  %v1897_v45 = vadd.f32 %v5252_v33, %v1883_v4  ;;  %v4253_v33 = vld [vmem:[%s5363_s26 + $0x18] sm:$0xff]  ;;  %v4271_v21 = vld [vmem:[%s5363_s26 + $0xa8] sm:$0xff]  ;;  %v4266_v4 = vld [vmem:[%s5363_s26 + $0x80] sm:$0xff] }
 0x142   : > { %2580 = vmatpush.bf16.msra.mxu1 %v4265_v23  ;;  %2273 = vmatmul.bf16.vlgmr.msrb.gmra.mxu2 %v4930_v44  ;;  %v1983_v44 = vadd.f32 %v1982_v24, %v1968_v22  ;;  %v4270_v22 = vld [vmem:[%s5363_s26 + $0xa0] sm:$0xff]  ;;  %v4269_v23 = vld [vmem:[%s5363_s26 + $0x98] sm:$0xff] }
 0x143   : > { %2287 = vmatmul.bf16.vlgmr.msrb.gmra.mxu3 %v4936_v48  ;;  %v1899_v48 = vadd.f32 %v5284_v19, %v1885_v46  ;;  %v1911_v15 = vadd.f32 %v5292_v29, %v1897_v45 }
 0x144   : > { %v1997_v47 = vadd.f32 %v1996_v35, %v1983_v44 }
 0x145   : > { %2567 = vmatpush.bf16.msra.mxu0 %v4256_v27  ;;  %v1913_v43 = vadd.f32 %v5322_v1, %v1899_v48  ;;  %v2050_v52 = vpop.f32.mrf.mxu2  ;;  %v1925_v53 = vadd.f32 %v5296_v34, %v1911_v15  ;;  %v2024_v29 = vpop.f32.mrf.mxu0  ;;  %v4273_v1 = vld [vmem:[%s5363_s26 + $0xb8] sm:$0xff]  ;;  %v4267_v27 = vld [vmem:[%s5363_s26 + $0x88] sm:$0xff] }
 0x146   : > { %2581 = vmatpush.bf16.msra.mxu1 %v4264_v30  ;;  %v2011_v2 = vadd.f32 %v2010_v40, %v1997_v47  ;;  %2594 = vmatpush.bf16.msra.mxu2 %v4273_v1  ;;  %v2038_v61 = vpop.f32.mrf.mxu1 }
 0x147   : > { %v1927_v19 = vadd.f32 %v5327_v9, %v1913_v43  ;;  %v1939_v34 = vadd.f32 %v5313_v57, %v1925_v53  ;;  %v2051_v9 = vadd.f32 %v2050_v52, %v2037_v54 }
 0x148   : > { %v2064_v55 = vpop.f32.mrf.mxu3  ;;  %v2025_v59 = vadd.f32 %v2024_v29, %v2011_v2 }
 0x149   : > { %2568 = vmatpush.bf16.msra.mxu0 %v4255_v32  ;;  %v1941_v18 = vadd.f32 %v5342_v37, %v1927_v19  ;;  %v1953_v5 = vadd.f32 %v5318_v62, %v1939_v34  ;;  %v2065_v6 = vadd.f32 %v2064_v55, %v2051_v9  ;;  %v4281_v19 = vld [vmem:[%s5363_s26 + $0xf8] sm:$0xff]  ;;  %v4280_v55 = vld [vmem:[%s5363_s26 + $0xf0] sm:$0xff] }
 0x14a   : > { %2582 = vmatpush.bf16.msra.mxu1 %v4263_v50  ;;  %v2039_v0 = vadd.f32 %v2038_v61, %v2025_v59  ;;  %2595 = vmatpush.bf16.msra.mxu2 %v4272_v60  ;;  %v4278_v60 = vld [vmem:[%s5363_s26 + $0xe0] sm:$0xff]  ;;  %v4277_v61 = vld [vmem:[%s5363_s26 + $0xd8] sm:$0xff]  ;;  %v4276_v34 = vld [vmem:[%s5363_s26 + $0xd0] sm:$0xff] }
 0x14b   : > { %v1955_v63 = vadd.f32 %v5344_v39, %v1941_v18  ;;  %v2293_v39 = vmul.f32 %v1953_v5, %v1953_v5  ;;  %v2294_v16 = vmul.f32 %v2065_v6, %v2065_v6  ;;  %2608 = vmatpush.bf16.msra.mxu3 %v4281_v19 }
 0x14d   : > { %2569 = vmatpush.bf16.msra.mxu0 %v4254_v31  ;;  %v2052_v37 = vpop.f32.mrf.mxu2  ;;  %v2297_v57 = vmul.f32 %v1955_v63, %v1955_v63 }
 0x14e   : > { %2583 = vmatpush.bf16.msra.mxu1 %v4262_v42  ;;  %v2053_v7 = vadd.f32 %v2052_v37, %v2039_v0  ;;  %2596 = vmatpush.bf16.msra.mxu2 %v4271_v21  ;;  %v4274_v0 = vld [vmem:[%s5363_s26 + $0xc0] sm:$0xff] }
 0x14f   : > { %v2303_v20 = vpack.c.bf16 %v2297_v57, %v2293_v39  ;;  %2609 = vmatpush.bf16.msra.mxu3 %v4280_v55 }
 0x150   : > { %v2066_v8 = vpop.f32.mrf.mxu3 }
 0x151   : > { %2570 = vmatpush.bf16.msra.mxu0 %v4253_v33  ;;  %v2067_v13 = vadd.f32 %v2066_v8, %v2053_v7 }
 0x152   : > { %2584 = vmatpush.bf16.msra.mxu1 %v4261_v51  ;;  %2597 = vmatpush.bf16.msra.mxu2 %v4270_v22 }
 0x153   : > { %v2298_v17 = vmul.f32 %v2067_v13, %v2067_v13 }
 0x155   : > { %2571 = vmatpush.bf16.msra.mxu0 %v4252_v56  ;;  %v2304_v62 = vpack.c.bf16 %v2298_v17, %v2294_v16 }
 0x156   : > { %2585 = vmatpush.bf16.msra.mxu1 %v4260_v58  ;;  %2598 = vmatpush.bf16.msra.mxu2 %v4269_v23  ;;  %v4279_v58 = vld [vmem:[%s5363_s26 + $0xe8] sm:$0xff] }
 0x157   : > { %2610 = vmatpush.bf16.msra.mxu3 %v4279_v58 }
 0x159   : > { %2572 = vmatpush.bf16.msra.mxu0 %v4251_v11  ;;  %v4275_v11 = vld [vmem:[%s5363_s26 + $0xc8] sm:$0xff] }
 0x15a   : > { %2586 = vmatpush.bf16.msra.mxu1 %v4259_v3  ;;  %2599 = vmatpush.bf16.msra.mxu2 %v4268_v25 }
 0x15b   : > { %2611 = vmatpush.bf16.msra.mxu3 %v4278_v60 }
 0x15d   : > { %2573 = vmatpush.bf16.msra.mxu0 %v4250_v12  ;;  %v2078_v24 = vpop.f32.mrf.mxu0 }
 0x15e   : > { %2587 = vmatpush.bf16.msra.mxu1 %v4258_v14  ;;  %v2092_v26 = vpop.f32.mrf.mxu1  ;;  %2600 = vmatpush.bf16.msra.mxu2 %v4267_v27 }
 0x15f   : > { %v2093_v35 = vadd.f32 %v2092_v26, %v2078_v24  ;;  %2612 = vmatpush.bf16.msra.mxu3 %v4277_v61 }
 0x160   : > { %2574 = vmatmul.bf16.vlgmr.msra.gmra.mxu0 %v2303_v20 }
 0x161   : > { %2588 = vmatmul.bf16.vlgmr.msra.gmra.mxu1 %v2304_v62 }
 0x162   : > { %2601 = vmatpush.bf16.msra.mxu2 %v4266_v4 }
 0x163   : > { %2613 = vmatpush.bf16.msra.mxu3 %v4276_v34 }
 0x165   : > { %v2106_v28 = vpop.f32.mrf.mxu2  ;;  %v2080_v10 = vpop.f32.mrf.mxu0 }
 0x166   : > { %v2120_v30 = vpop.f32.mrf.mxu3  ;;  %v2094_v32 = vpop.f32.mrf.mxu1  ;;  %v2107_v46 = vadd.f32 %v2106_v28, %v2093_v35 }
 0x167   : > { %v2095_v36 = vadd.f32 %v2094_v32, %v2080_v10  ;;  %2614 = vmatpush.bf16.msra.mxu3 %v4275_v11 }
 0x168   : > { %v2121_v45 = vadd.f32 %v2120_v30, %v2107_v46 }
 0x16b   : > { %2615 = vmatpush.bf16.msra.mxu3 %v4274_v0 }
 0x16d   : > { %v2108_v40 = vpop.f32.mrf.mxu2 }
 0x16e   : > { %v2122_v50 = vpop.f32.mrf.mxu3  ;;  %v2109_v31 = vadd.f32 %v2108_v40, %v2095_v36 }
 0x170   : > { %v2123_v42 = vadd.f32 %v2122_v50, %v2109_v31 }
 0x17d   : > { %v2134_v44 = vpop.f32.mrf.mxu0 }
 0x17e   : > { %v2148_v38 = vpop.f32.mrf.mxu1  ;;  %v2135_v41 = vadd.f32 %v2134_v44, %v2121_v45 }
 0x180   : > { %v2149_v15 = vadd.f32 %v2148_v38, %v2135_v41  ;;  %v2301_v41 = vld [vmem:[#allocation2] sm:$0xff] }
 0x185   : > { %v2162_v48 = vpop.f32.mrf.mxu2  ;;  %v2136_v43 = vpop.f32.mrf.mxu0 }
 0x186   : > { %v2176_v47 = vpop.f32.mrf.mxu3  ;;  %v2137_v49 = vadd.f32 %v2136_v43, %v2123_v42  ;;  %v2150_v33 = vpop.f32.mrf.mxu1  ;;  %v2163_v51 = vadd.f32 %v2162_v48, %v2149_v15 }
 0x188   : > { %v2151_v52 = vadd.f32 %v2150_v33, %v2137_v49  ;;  %v2177_v2 = vadd.f32 %v2176_v47, %v2163_v51 }
 0x18a   : > { %v2295_v56 = vmul.f32 %v2177_v2, %v2177_v2 }
 0x18d   : > { %v2164_v53 = vpop.f32.mrf.mxu2 }
 0x18e   : > { %v2165_v54 = vadd.f32 %v2164_v53, %v2151_v52  ;;  %v2178_v29 = vpop.f32.mrf.mxu3  ;;  %v2302_v52 = vld [vmem:[#allocation2 + $0x8] sm:$0xff] }
 0x190   : > { %v2179_v1 = vadd.f32 %v2178_v29, %v2165_v54 }
 0x192   : > { %v2299_v18 = vmul.f32 %v2179_v1, %v2179_v1 }
 0x194   : > { %v2305_v59 = vpack.c.bf16 %v2299_v18, %v2295_v56 }
 0x196   : > { %2602 = vmatmul.bf16.vlgmr.msra.gmra.mxu2 %v2305_v59 }
 0x19d   : > { %v2190_v9 = vpop.f32.mrf.mxu0 }
 0x19e   : > { %v2204_v63 = vpop.f32.mrf.mxu1 }
 0x19f   : > { %v2205_v7 = vadd.f32 %v2204_v63, %v2190_v9 }
 0x1a5   : > { %v2218_v3 = vpop.f32.mrf.mxu2  ;;  %v2192_v5 = vpop.f32.mrf.mxu0 }
 0x1a6   : > { %v2232_v37 = vpop.f32.mrf.mxu3  ;;  %v2206_v6 = vpop.f32.mrf.mxu1  ;;  %v2219_v12 = vadd.f32 %v2218_v3, %v2205_v7 }
 0x1a7   : > { %v2207_v57 = vadd.f32 %v2206_v6, %v2192_v5 }
 0x1a8   : > { %v2233_v16 = vadd.f32 %v2232_v37, %v2219_v12 }
 0x1ad   : > { %v2220_v8 = vpop.f32.mrf.mxu2 }
 0x1ae   : > { %v2234_v13 = vpop.f32.mrf.mxu3  ;;  %v2221_v17 = vadd.f32 %v2220_v8, %v2207_v57 }
 0x1b0   : > { %v2235_v21 = vadd.f32 %v2234_v13, %v2221_v17 }
 0x1bd   : > { %v2246_v14 = vpop.f32.mrf.mxu0 }
 0x1be   : > { %v2260_v39 = vpop.f32.mrf.mxu1  ;;  %v2247_v20 = vadd.f32 %v2246_v14, %v2233_v16 }
 0x1c0   : > { %v2261_v24 = vadd.f32 %v2260_v39, %v2247_v20 }
 0x1c5   : > { %v2274_v62 = vpop.f32.mrf.mxu2  ;;  %v2248_v23 = vpop.f32.mrf.mxu0 }
 0x1c6   : > { %v2288_v22 = vpop.f32.mrf.mxu3  ;;  %v2249_v25 = vadd.f32 %v2248_v23, %v2235_v21  ;;  %v2275_v26 = vadd.f32 %v2274_v62, %v2261_v24  ;;  %v2262_v27 = vpop.f32.mrf.mxu1 }
 0x1c8   : > { %v2263_v28 = vadd.f32 %v2262_v27, %v2249_v25  ;;  %v2289_v4 = vadd.f32 %v2288_v22, %v2275_v26 }
 0x1ca   : > { %v2296_v46 = vmul.f32 %v2289_v4, %v2289_v4 }
 0x1cd   : > { %v2276_v30 = vpop.f32.mrf.mxu2 }
 0x1ce   : > { %v2277_v10 = vadd.f32 %v2276_v30, %v2263_v28  ;;  %v2290_v32 = vpop.f32.mrf.mxu3 }
 0x1d0   : > { %v2291_v35 = vadd.f32 %v2290_v32, %v2277_v10 }
 0x1d2   : > { %v2300_v40 = vmul.f32 %v2291_v35, %v2291_v35 }
 0x1d4   : > { %v2306_v50 = vpack.c.bf16 %v2300_v40, %v2296_v46 }
 0x1d6   : > { %2616 = vmatmul.bf16.vlgmr.msra.gmra.mxu3 %v2306_v50 }
 0x1dd   : > { %v2575_v36 = vpop.f32.mrf.mxu0 }
 0x1de   : > { %v2589_v45 = vpop.f32.mrf.mxu1 }
 0x1df   : > { %v2590_v38 = vadd.f32 %v2589_v45, %v2575_v36 }
 0x1e5   : > { %v2577_v47 = vpop.f32.mrf.mxu0 }
 0x1e6   : > { %v2591_v15 = vpop.f32.mrf.mxu1 }
 0x1e7   : > { %v2592_v33 = vadd.f32 %v2591_v15, %v2577_v47 }
 0x219   : > { %v2603_v44 = vpop.f32.mrf.mxu2 }
 0x21a   : > { %v2604_v31 = vadd.f32 %v2603_v44, %v2590_v38 }
 0x221   : > { %v2605_v49 = vpop.f32.mrf.mxu2 }
 0x222   : > { %v2606_v51 = vadd.f32 %v2605_v49, %v2592_v33 }
 0x259   : > { %v2617_v48 = vpop.f32.mrf.mxu3 }
 0x25a   : > { %v2618_v42 = vadd.f32 %v2617_v48, %v2604_v31 }
 0x25c   : > { %v2622_v43 = vadd.f32 %v2618_v42, %v2301_v41 }
 0x25e   : > { %2624 = vst [vmem:[#allocation2] sm:$0xff] %v2622_v43 }
 0x261   : > { %v2619_v53 = vpop.f32.mrf.mxu3 }
 0x262   : > { %v2620_v19 = vadd.f32 %v2619_v53, %v2606_v51  ;;  %2629 = sbr.rel (%p3977_p1) target bundleno = 634 (0x27a), region = 52 }
 0x264   : > { %v2623_v2 = vadd.f32 %v2620_v19, %v2302_v52 }
 0x266   : > { %2625 = vst [vmem:[#allocation2 + $0x8] sm:$0xff] %v2623_v2 }
 0x267   : > { %v2630_v54 = vld [vmem:[#allocation2] sm:$0xff] }
 0x268   : > { %v2632_v55 = vadd.f32 1e-16, %v2630_v54 }
 0x26a   : > { %4391 = vlog2.f32 %v2632_v55 }
 0x26d   : > { %v2631_v29 = vld [vmem:[#allocation2 + $0x8] sm:$0xff] }
 0x26e   : > { %v2633_v1 = vadd.f32 1e-16, %v2631_v29 }
 0x270   : > { %4393 = vlog2.f32 %v2633_v1  ;;  %v4392_v56 = vpop.eup %4391 }
 0x271   : > { %v2635_v59 = vmul.f32 0.6931472, %v4392_v56 }
 0x273   : > { %2638 = vst [vmem:[%s4752_s17] sm:$0xff] %v2635_v59 }
 0x276   : > { %v4394_v18 = vpop.eup %4393 }
 0x277   : > { %v2637_v58 = vmul.f32 0.6931472, %v4394_v18 }
 0x279   : > { %2639 = vst [vmem:[%s4752_s17 + $0x8] sm:$0xff] %v2637_v58 }
 0x27a PF: > { %s4282_s15 = sshll.u32 %s4575_s16, 4  ;;  %s2655_s10 = sshll.u32 %s4752_s17, 4  ;;  %s2656_s10 = int_to_ptr.vmem [resolvable:$true] %s2655_s10 }
 0x27b   : > { %s2654_s9 = scalar_lea.hbm %s5467_s3, %s4282_s15  ;;  %s2641_s11 = scalar_lea.sflag [#allocation5], %s4737_s6 }
 0x27c   : > { %s2657_s23 = sshll.u32 %s2654_s9, 4  ;;  %s4505_s16 = scalar_lea.hbm %s5467_s3, 32  ;;  %s2658_s23 = int_to_ptr.hbm [resolvable:$true] %s2657_s23 }
 0x27d   : > { %s4499_s20 = sshra.s32 %s2658_s23, 4  ;;  %s4500_s20 = int_to_ptr.hbm [resolvable:$true] %s4499_s20 }
 0x27e   : > { %s4501_s21 = scalar_lea.hbm %s4500_s20, 16  ;;  %p4506_p12 = scmp.lt.s32.totalorder %s4500_s20, %s5467_s3 }
 0x27f   : > { %p4502_p4 = scmp.ne.s32.totalorder %s4500_s20, %s4501_s21  ;;  %p4507_p13 = scmp.lt.s32.totalorder %s4505_s16, %s4501_s21 }
 0x281   : > { %p4503_p10 = pnand %p4502_p4, %p4713_p3  ;;  %p4508_p0 = por %p4507_p13, %p4506_p12 }
 0x283   : > { %p4504_p11 = pneg %p4503_p10 }
 0x285   : > { %p4509_p5 = pnand %p4508_p0, %p4504_p11 }
 0x287   : > { %4512 = shalt.err (!%p4509_p5)
}
 0x288   : > { %s4598_s6 = smov 128   ;;  %s4599_s17 = smov 8  }
 0x289   : > { %4293 = dma.vmem_to_hbm [thread:$0]  (%p4713_p3), %s2656_s10, 256, %s2658_s23, %s2641_s11, %s4598_s6, %s4598_s6, %s4599_s17  }
 0x28a PF: > { %p4315_p7 = scmp.ge.s32.totalorder %s4587_s19, 2  ;;  %s2672_s24 = sand.u32 1, %s4559_s12  }
 0x28b   : > { %s2673_s29 = scalar_lea.sflag [#allocation5], %s2672_s24 }
 0x28c   : > { %p4307_p9 = pnand %p4315_p7, %p4679_p6 }
 0x28e   : > { %p4308_p2 = pneg %p4307_p9 }
 0x290   : > { %4554 = dma.done.wait (%p4308_p2), %s2673_s29, 256  }
 0x291   : > { %4556 = vsyncadd (%p4308_p2), %s2673_s29, 4294967040  ;;  %s20_s19 = sadd.s32 1, %s4587_s19   ;;  %s5482_s15 = sld [smem:[#allocation13_spill]] }
 0x292   : > { %p17_p8 = scmp.ge.s32.totalorder %s20_s19, 6   ;;  %s5483_s17 = sld [smem:[#allocation14_spill]] }
 0x293   : > { %s5484_s12 = smov %s4563_s13  ;;  %s5485_s13 = smov %s4567_s14 }
 0x294   : > { %s5486_s14 = smov %s4728_s1  ;;  %s5487_s16 = smov %s4583_s18 }
 0x295   : > { %s5488_s18 = smov %s5494_s27  ;;  %19 = sbr.rel (!%p17_p8) target bundleno = 11 (0xb), region = 95 }
 0x29a   :  { %2679 = vsyncpa [#allocation4], 1 }
 0x29b   :  { %2681 = vsyncpa [#allocation4 + $0x1], 1 }
 0x29c   :  { %2682 = vsyncpa [#allocation7], 1 }
 0x29d   :  { %2683 = vsyncpa [#allocation5], 1 }
 0x29e   :  { %2685 = vsyncpa [#allocation5 + $0x1], 1 }

</bundles_post_ra>
